<compile_context>
chip_gen: v5e
topology: v5e:2x2
jax: 0.10.0
libtpu: 0.0.40
codegen_flags: <defaults>
</compile_context>

<pallas_src>
import functools

import numpy as np
import jax
import jax.numpy as jnp
from jax.experimental import pallas as pl
from jax.experimental.pallas import tpu as pltpu


# --------------------------------------------------------------------------
# Pallas kernel (fully fused PSP forward, one grid step per batch element)
# --------------------------------------------------------------------------
def _psp_fused_kernel(x_ref, pool_ref, up_ref, wcat_ref, zmask_ref, zshift_ref,
                      wrow_ref, bsh_ref, edge_ref, o_ref, slab_ref, *, H, W, O):
    # x_ref:     (1, HW, C)      feats, spatial flattened, channel-last
    # pool_ref:  (P, HW)         stacked adaptive-avg-pool operators (zero-padded rows)
    # up_ref:    (HW, P)         stacked bilinear align_corners upsample operators
    # wcat_ref:  (C, S*O)        all stage 1x1 weights (BN scale folded), concatenated
    # zmask_ref: (P, S*O)        block-diagonal stage selector
    # zshift_ref:(P, S*O)        block-diagonal folded BN shifts (pre-upsample)
    # wrow_ref:  (3, Ct, 3*O)    3x3-conv row taps; column taps stacked on last dim
    # bsh_ref:   (1, O)          folded BN shift for the bottleneck
    # edge_ref:  (HW, 2)         boundary-column masks for the +/-1 column shifts
    # o_ref:     (1, HW, O_pad)  lane-dense (O padded to 128) output
    # slab_ref:  ((H+2)*W, Ct)   VMEM scratch: row-padded concat slab
    HW = H * W
    C = x_ref.shape[-1]
    Ct = slab_ref.shape[-1]
    O_pad = o_ref.shape[-1]

    x = x_ref[0]                                                   # (HW, C)

    # --- all pyramid stages as one stacked pipeline ------------------------
    pooled = jnp.dot(pool_ref[...], x,
                     preferred_element_type=jnp.float32)           # (P, C)
    z = jnp.dot(pooled, wcat_ref[...],
                preferred_element_type=jnp.float32)                # (P, S*O)
    # block-diagonal select + folded BN shift (applied before the upsample,
    # exactly as BatchNorm acts at pooled resolution in the reference)
    z = z * zmask_ref[...] + zshift_ref[...]
    priors = jnp.dot(up_ref[...], z,
                     preferred_element_type=jnp.float32)           # (HW, S*O)

    # --- build the row-padded flat slab for the 3x3 conv -------------------
    cat = jnp.concatenate([priors, x], axis=-1)                    # (HW, Ct) torch.cat order
    slab_ref[pl.ds(0, W), :] = jnp.zeros((W, Ct), jnp.float32)          # top pad row
    slab_ref[pl.ds((H + 1) * W, W), :] = jnp.zeros((W, Ct), jnp.float32)  # bottom pad row
    slab_ref[pl.ds(W, HW), :] = cat                                # image rows

    # --- 3x3 conv: 3 aligned row-tap matmuls (starts 0, W, 2W) -------------
    # Each contracts the full Ct against (Ct, 3*O) = [W(dy,dx=0)|W(dy,1)|W(dy,2)],
    # so the accumulator already holds the three column-tap partial sums.
    u = jnp.dot(slab_ref[pl.ds(0, HW), :], wrow_ref[0],
                preferred_element_type=jnp.float32)                # init from tap 0
    u = u + jnp.dot(slab_ref[pl.ds(W, HW), :], wrow_ref[1],
                    preferred_element_type=jnp.float32)
    u = u + jnp.dot(slab_ref[pl.ds(2 * W, HW), :], wrow_ref[2],
                    preferred_element_type=jnp.float32)            # (HW, 3*O)

    # --- +/-1 column shift on the narrow (HW, O) partials only -------------
    u0 = u[:, 0:O]               # left-neighbour partial  (shift +1 along x)
    u1 = u[:, O:2 * O]           # centre partial
    u2 = u[:, 2 * O:3 * O]       # right-neighbour partial (shift -1 along x)
    zrow = jnp.zeros((1, O), jnp.float32)
    v0 = jnp.concatenate([zrow, u0[:HW - 1, :]], axis=0) * edge_ref[:, 0:1]
    v2 = jnp.concatenate([u2[1:, :], zrow], axis=0) * edge_ref[:, 1:2]
    res = u1 + v0 + v2 + bsh_ref[...]                              # (HW, O)

    # --- lane-dense output store (O padded up to 128) ----------------------
    o_ref[0] = jnp.concatenate(
        [res, jnp.zeros((HW, O_pad - O), jnp.float32)], axis=-1)


# --------------------------------------------------------------------------
# Wrapper
# --------------------------------------------------------------------------
def psp_forward_pallas(feats_nhwc, params):
    B, H, W, C = feats_nhwc.shape
    P, HW = params["pool"].shape
    SO = params["w_cat"].shape[1]
    _, Ct, threeO = params["wrow"].shape
    O = params["bott_shift"].shape[1]
    assert HW == H * W and Ct == C + SO and threeO == 3 * O
    O_pad = ((O + 127) // 128) * 128        # lane-dense output store

    x_flat = feats_nhwc.reshape(B, HW, C)

    flops = int(B * (2 * (P * HW * C + P * C * SO + HW * P * SO)
                     + 2 * 3 * HW * Ct * threeO))
    bytes_accessed = int(4 * (x_flat.size
                              + sum(int(np.prod(v.shape)) for v in params.values())
                              + B * HW * O_pad))

    kernel = functools.partial(_psp_fused_kernel, H=H, W=W, O=O)

    out_flat = pl.pallas_call(
        kernel,
        out_shape=jax.ShapeDtypeStruct((B, HW, O_pad), jnp.float32),
        grid=(B,),
        in_specs=[
            pl.BlockSpec((1, HW, C), lambda b: (b, 0, 0)),      # feats (per-b)
            pl.BlockSpec((P, HW), lambda b: (0, 0)),            # resident operators
            pl.BlockSpec((HW, P), lambda b: (0, 0)),
            pl.BlockSpec((C, SO), lambda b: (0, 0)),
            pl.BlockSpec((P, SO), lambda b: (0, 0)),
            pl.BlockSpec((P, SO), lambda b: (0, 0)),
            pl.BlockSpec((3, Ct, threeO), lambda b: (0, 0, 0)),
            pl.BlockSpec((1, O), lambda b: (0, 0)),
            pl.BlockSpec((HW, 2), lambda b: (0, 0)),
        ],
        out_specs=pl.BlockSpec((1, HW, O_pad), lambda b: (b, 0, 0)),
        scratch_shapes=[pltpu.VMEM(((H + 2) * W, Ct), jnp.float32)],
        compiler_params=pltpu.CompilerParams(
            dimension_semantics=("parallel",),
            vmem_limit_bytes=32 * 1024 * 1024),
        cost_estimate=pl.CostEstimate(flops=flops, transcendentals=0,
                                      bytes_accessed=bytes_accessed),
    )(x_flat, params["pool"], params["up"], params["w_cat"],
      params["z_mask"], params["z_shift"], params["wrow"],
      params["bott_shift"], params["edge"])

    # Dropout2d(p) is identity in eval mode.
    return out_flat[:, :, :O].reshape(B, H, W, O)


# --------------------------------------------------------------------------
# Deterministic parameter setup + packed operator matrices (glue)
# --------------------------------------------------------------------------
def _adaptive_pool_matrix(s, n):
    Pm = np.zeros((s, n), np.float32)
    for i in range(s):
        a = (i * n) // s
        b = -((-(i + 1) * n) // s)          # ceil((i+1)*n/s)
        Pm[i, a:b] = 1.0 / (b - a)
    return Pm


def _upsample_matrix(n_out, s):
    # bilinear, align_corners=True
    U = np.zeros((n_out, s), np.float32)
    for y in range(n_out):
        if s == 1:
            U[y, 0] = 1.0
            continue
        pos = y * (s - 1) / (n_out - 1)
        i0 = min(int(np.floor(pos)), s - 1)
        i1 = min(i0 + 1, s - 1)
        f = pos - i0
        U[y, i0] += 1.0 - f
        U[y, i1] += f
    return U


def make_params(key, C, O, sizes, H, W, eps=1e-5):
    S = len(sizes)
    HW = H * W
    SO = S * O
    Ct = C + SO
    p_raw = int(sum(s * s for s in sizes))
    P = ((p_raw + 7) // 8) * 8                 # pad stacked pool rows to sublane multiple
    offs = np.cumsum([0] + [s * s for s in sizes])

    ks = jax.random.split(key, 2 * S + 2)

    w1, bn1 = [], []
    w_cat = np.zeros((C, SO), np.float32)
    z_mask = np.zeros((P, SO), np.float32)
    z_shift = np.zeros((P, SO), np.float32)
    pool_all = np.zeros((P, HW), np.float32)
    up_all = np.zeros((HW, P), np.float32)
    for si, s in enumerate(sizes):
        w = 0.3 * np.asarray(jax.random.normal(ks[si], (O, C)), np.float32)
        kb = jax.random.split(ks[S + si], 4)
        gamma = np.asarray(jax.random.uniform(kb[0], (O,), minval=0.8, maxval=1.2), np.float32)
        beta = 0.1 * np.asarray(jax.random.normal(kb[1], (O,)), np.float32)
        mean = 0.1 * np.asarray(jax.random.normal(kb[2], (O,)), np.float32)
        var = np.asarray(jax.random.uniform(kb[3], (O,), minval=0.5, maxval=1.5), np.float32)
        w1.append(w)
        bn1.append((gamma, beta, mean, var))
        scale = gamma / np.sqrt(var + eps)
        shift = beta - mean * scale
        w_cat[:, si * O:(si + 1) * O] = w.T * scale[None, :]
        r0, r1 = int(offs[si]), int(offs[si + 1])
        z_mask[r0:r1, si * O:(si + 1) * O] = 1.0
        z_shift[r0:r1, si * O:(si + 1) * O] = shift[None, :]
        Ph, Pw = _adaptive_pool_matrix(s, H), _adaptive_pool_matrix(s, W)
        Uh, Uw = _upsample_matrix(H, s), _upsample_matrix(W, s)
        pool_all[r0:r1, :] = np.kron(Ph, Pw)      # (s^2, HW)
        up_all[:, r0:r1] = np.kron(Uh, Uw)        # (HW, s^2)

    # bottleneck 3x3 conv + BN, folded into row-tap matrices (Ct, 3*O)
    w3 = 0.1 * np.asarray(jax.random.normal(ks[2 * S], (O, Ct, 3, 3)), np.float32)
    kb = jax.random.split(ks[2 * S + 1], 4)
    gamma = np.asarray(jax.random.uniform(kb[0], (O,), minval=0.8, maxval=1.2), np.float32)
    beta = 0.1 * np.asarray(jax.random.normal(kb[1], (O,)), np.float32)
    mean = 0.1 * np.asarray(jax.random.normal(kb[2], (O,)), np.float32)
    var = np.asarray(jax.random.uniform(kb[3], (O,), minval=0.5, maxval=1.5), np.float32)
    scale = gamma / np.sqrt(var + eps)
    # wrow[dy, c, dx*O + o] = w3[o, c, dy, dx] * scale[o]
    wt = np.transpose(w3, (2, 3, 1, 0))                         # (3, 3, Ct, O)
    wrow = (np.transpose(wt, (0, 2, 1, 3)) * scale[None, None, None, :]
            ).reshape(3, Ct, 3 * O).astype(np.float32)
    bott_shift = (beta - mean * scale).reshape(1, O).astype(np.float32)

    # boundary-column masks for the +/-1 column-tap shifts
    xcol = np.arange(HW) % W
    edge = np.ones((HW, 2), np.float32)
    edge[xcol == 0, 0] = 0.0
    edge[xcol == W - 1, 1] = 0.0

    params = dict(
        pool=jnp.asarray(pool_all),
        up=jnp.asarray(up_all),
        w_cat=jnp.asarray(w_cat),
        z_mask=jnp.asarray(z_mask),
        z_shift=jnp.asarray(z_shift),
        wrow=jnp.asarray(wrow),
        bott_shift=jnp.asarray(bott_shift),
        edge=jnp.asarray(edge),
    )
    raw = dict(w1=w1, bn1=bn1, w3=w3, bn3=(gamma, beta, mean, var))
    return params, raw


# --------------------------------------------------------------------------
# Pure numpy reference (NCHW, mirrors the PyTorch module in eval mode)
# --------------------------------------------------------------------------
def _adaptive_avg_pool2d_np(x, s):
    B, C, H, W = x.shape
    out = np.zeros((B, C, s, s), x.dtype)
    for i in range(s):
        h0, h1 = (i * H) // s, -((-(i + 1) * H) // s)
        for j in range(s):
            w0, w1 = (j * W) // s, -((-(j + 1) * W) // s)
            out[:, :, i, j] = x[:, :, h0:h1, w0:w1].mean(axis=(2, 3))
    return out


def _upsample_bilinear_align_np(z, H, W):
    B, C, s, _ = z.shape
    out = np.zeros((B, C, H, W), z.dtype)
    for y in range(H):
        if s == 1:
            y0 = y1 = 0; fy = 0.0
        else:
            py = y * (s - 1) / (H - 1)
            y0 = min(int(np.floor(py)), s - 1); y1 = min(y0 + 1, s - 1); fy = py - y0
        for x in range(W):
            if s == 1:
                x0 = x1 = 0; fx = 0.0
            else:
                px = x * (s - 1) / (W - 1)
                x0 = min(int(np.floor(px)), s - 1); x1 = min(x0 + 1, s - 1); fx = px - x0
            out[:, :, y, x] = ((1 - fy) * (1 - fx) * z[:, :, y0, x0]
                               + (1 - fy) * fx * z[:, :, y0, x1]
                               + fy * (1 - fx) * z[:, :, y1, x0]
                               + fy * fx * z[:, :, y1, x1])
    return out


def psp_reference_nchw(feats_nchw, raw, sizes, eps=1e-5):
    feats = np.asarray(feats_nchw, np.float64)
    B, C, H, W = feats.shape
    priors = []
    for si, s in enumerate(sizes):
        pooled = _adaptive_avg_pool2d_np(feats, s)
        z = np.einsum('oc,bcij->boij', raw["w1"][si].astype(np.float64), pooled)
        g, b_, m, v = [np.asarray(a, np.float64) for a in raw["bn1"][si]]
        scale = g / np.sqrt(v + eps)
        shift = b_ - m * scale
        z = z * scale[None, :, None, None] + shift[None, :, None, None]
        priors.append(_upsample_bilinear_align_np(z, H, W))
    cat = np.concatenate(priors + [feats], axis=1)
    w3 = raw["w3"].astype(np.float64)
    O, Ct = w3.shape[0], w3.shape[1]
    xp = np.zeros((B, Ct, H + 2, W + 2), np.float64)
    xp[:, :, 1:H + 1, 1:W + 1] = cat
    conv = np.zeros((B, O, H, W), np.float64)
    for dy in range(3):
        for dx in range(3):
            conv += np.einsum('oc,bcyx->boyx', w3[:, :, dy, dx],
                              xp[:, :, dy:dy + H, dx:dx + W])
    g, b_, m, v = [np.asarray(a, np.float64) for a in raw["bn3"]]
    scale = g / np.sqrt(v + eps)
    shift = b_ - m * scale
    out = conv * scale[None, :, None, None] + shift[None, :, None, None]
    return out.astype(np.float32)


# --------------------------------------------------------------------------
if __name__ == "__main__":
    B, C, H, W = 2, 4, 16, 16          # small shapes; features=C
    out_features = 8
    sizes = (1, 2, 3, 6)

    key = jax.random.PRNGKey(0)
    k_x, k_p = jax.random.split(key)
    feats_nhwc = jax.random.normal(k_x, (B, H, W, C), jnp.float32)

    params, raw = make_params(k_p, C, out_features, sizes, H, W)

    out = psp_forward_pallas(feats_nhwc, params)
    out = jax.block_until_ready(out)

    # Correctness check against a pure numpy NCHW reference (f64 accumulation).
    feats_nchw = np.asarray(feats_nhwc).transpose(0, 3, 1, 2)
    ref = psp_reference_nchw(feats_nchw, raw, sizes)
    np.testing.assert_allclose(np.asarray(out), ref.transpose(0, 2, 3, 1),
                               rtol=2e-4, atol=2e-3)

    print("KERNEL_OK")
</pallas_src>

<mosaic_0001>
module attributes {stable_mosaic.version = 11 : i64} {
  func.func @_psp_fused_kernel(%arg0: i32, %arg1: memref<1x256x4xf32, #tpu.memory_space<vmem>>, %arg2: memref<56x256xf32, #tpu.memory_space<vmem>>, %arg3: memref<256x56xf32, #tpu.memory_space<vmem>>, %arg4: memref<4x32xf32, #tpu.memory_space<vmem>>, %arg5: memref<56x32xf32, #tpu.memory_space<vmem>>, %arg6: memref<56x32xf32, #tpu.memory_space<vmem>>, %arg7: memref<3x36x24xf32, #tpu.memory_space<vmem>>, %arg8: memref<1x8xf32, #tpu.memory_space<vmem>>, %arg9: memref<256x2xf32, #tpu.memory_space<vmem>>, %arg10: memref<1x256x128xf32, #tpu.memory_space<vmem>>, %arg11: memref<288x36xf32, #tpu.memory_space<vmem>>) attributes {dimension_semantics = [#tpu.dimension_semantics<parallel>], iteration_bounds = array<i64: 2>, scalar_prefetch = 0 : i64, scratch_operands = 1 : i64, tpu.core_type = #tpu.core_type<tc>, window_params = [{transform_indices = @transform_0, window_bounds = array<i64: 1, 256, 4>}, {pipeline_mode = #tpu.pipeline_mode<synchronous>, transform_indices = @transform_1, window_bounds = array<i64: 56, 256>}, {pipeline_mode = #tpu.pipeline_mode<synchronous>, transform_indices = @transform_2, window_bounds = array<i64: 256, 56>}, {pipeline_mode = #tpu.pipeline_mode<synchronous>, transform_indices = @transform_3, window_bounds = array<i64: 4, 32>}, {pipeline_mode = #tpu.pipeline_mode<synchronous>, transform_indices = @transform_4, window_bounds = array<i64: 56, 32>}, {pipeline_mode = #tpu.pipeline_mode<synchronous>, transform_indices = @transform_5, window_bounds = array<i64: 56, 32>}, {pipeline_mode = #tpu.pipeline_mode<synchronous>, transform_indices = @transform_6, window_bounds = array<i64: 3, 36, 24>}, {pipeline_mode = #tpu.pipeline_mode<synchronous>, transform_indices = @transform_7, window_bounds = array<i64: 1, 8>}, {pipeline_mode = #tpu.pipeline_mode<synchronous>, transform_indices = @transform_8, window_bounds = array<i64: 256, 2>}, {transform_indices = @transform_9, window_bounds = array<i64: 1, 256, 128>}]} {
    %c0 = arith.constant 0 : index
    %c0_0 = arith.constant 0 : index
    %c0_1 = arith.constant 0 : index
    %0 = vector.load %arg1[%c0, %c0_0, %c0_1] : memref<1x256x4xf32, #tpu.memory_space<vmem>>, vector<1x256x4xf32>
    %1 = vector.shape_cast %0 : vector<1x256x4xf32> to vector<256x4xf32>
    %c0_2 = arith.constant 0 : index
    %c0_3 = arith.constant 0 : index
    %2 = vector.load %arg2[%c0_2, %c0_3] : memref<56x256xf32, #tpu.memory_space<vmem>>, vector<56x256xf32>
    %cst = arith.constant dense<0.000000e+00> : vector<56x4xf32>
    %3 = tpu.matmul %2, %1, %cst {dimension_numbers = #tpu.dot_dimension_numbers<[1], [0], [0], [1], [0, 0, 1, 1], [], []>} : vector<56x256xf32>, vector<256x4xf32>, vector<56x4xf32> -> vector<56x4xf32>
    %c0_4 = arith.constant 0 : index
    %c0_5 = arith.constant 0 : index
    %4 = vector.load %arg4[%c0_4, %c0_5] : memref<4x32xf32, #tpu.memory_space<vmem>>, vector<4x32xf32>
    %cst_6 = arith.constant dense<0.000000e+00> : vector<56x32xf32>
    %5 = tpu.matmul %3, %4, %cst_6 {dimension_numbers = #tpu.dot_dimension_numbers<[1], [0], [0], [1], [0, 0, 1, 1], [], []>} : vector<56x4xf32>, vector<4x32xf32>, vector<56x32xf32> -> vector<56x32xf32>
    %c0_7 = arith.constant 0 : index
    %c0_8 = arith.constant 0 : index
    %6 = vector.load %arg5[%c0_7, %c0_8] : memref<56x32xf32, #tpu.memory_space<vmem>>, vector<56x32xf32>
    %7 = arith.mulf %5, %6 : vector<56x32xf32>
    %c0_9 = arith.constant 0 : index
    %c0_10 = arith.constant 0 : index
    %8 = vector.load %arg6[%c0_9, %c0_10] : memref<56x32xf32, #tpu.memory_space<vmem>>, vector<56x32xf32>
    %9 = arith.addf %7, %8 : vector<56x32xf32>
    %c0_11 = arith.constant 0 : index
    %c0_12 = arith.constant 0 : index
    %10 = vector.load %arg3[%c0_11, %c0_12] : memref<256x56xf32, #tpu.memory_space<vmem>>, vector<256x56xf32>
    %cst_13 = arith.constant dense<0.000000e+00> : vector<256x32xf32>
    %11 = tpu.matmul %10, %9, %cst_13 {dimension_numbers = #tpu.dot_dimension_numbers<[1], [0], [0], [1], [0, 0, 1, 1], [], []>} : vector<256x56xf32>, vector<56x32xf32>, vector<256x32xf32> -> vector<256x32xf32>
    %12 = tpu.concatenate %11, %1 in 1 : vector<256x32xf32>, vector<256x4xf32> -> vector<256x36xf32>
    %cst_14 = arith.constant 0.000000e+00 : f32
    %13 = vector.broadcast %cst_14 : f32 to vector<16x36xf32>
    %c0_15 = arith.constant 0 : index
    %c0_16 = arith.constant 0 : index
    %14 = vector.load %arg11[%c0_15, %c0_16] : memref<288x36xf32, #tpu.memory_space<vmem>>, vector<16x36xf32>
    tpu.vector_store %arg11[%c0_15, %c0_16], %13 {strides = array<i32>} : memref<288x36xf32, #tpu.memory_space<vmem>>, vector<16x36xf32>,
    %cst_17 = arith.constant 0.000000e+00 : f32
    %15 = vector.broadcast %cst_17 : f32 to vector<16x36xf32>
    %c272 = arith.constant 272 : index
    %c0_18 = arith.constant 0 : index
    %16 = vector.load %arg11[%c272, %c0_18] : memref<288x36xf32, #tpu.memory_space<vmem>>, vector<16x36xf32>
    tpu.vector_store %arg11[%c272, %c0_18], %15 {strides = array<i32>} : memref<288x36xf32, #tpu.memory_space<vmem>>, vector<16x36xf32>,
    %c16 = arith.constant 16 : index
    %c0_19 = arith.constant 0 : index
    %17 = vector.load %arg11[%c16, %c0_19] : memref<288x36xf32, #tpu.memory_space<vmem>>, vector<256x36xf32>
    tpu.vector_store %arg11[%c16, %c0_19], %12 {strides = array<i32>} : memref<288x36xf32, #tpu.memory_space<vmem>>, vector<256x36xf32>,
    %c0_20 = arith.constant 0 : index
    %c0_21 = arith.constant 0 : index
    %18 = vector.load %arg11[%c0_20, %c0_21] : memref<288x36xf32, #tpu.memory_space<vmem>>, vector<256x36xf32>
    %c0_22 = arith.constant 0 : index
    %c0_23 = arith.constant 0 : index
    %c0_24 = arith.constant 0 : index
    %19 = vector.load %arg7[%c0_22, %c0_23, %c0_24] : memref<3x36x24xf32, #tpu.memory_space<vmem>>, vector<1x36x24xf32>
    %20 = vector.shape_cast %19 : vector<1x36x24xf32> to vector<36x24xf32>
    %cst_25 = arith.constant dense<0.000000e+00> : vector<256x24xf32>
    %21 = tpu.matmul %18, %20, %cst_25 {dimension_numbers = #tpu.dot_dimension_numbers<[1], [0], [0], [1], [0, 0, 1, 1], [], []>} : vector<256x36xf32>, vector<36x24xf32>, vector<256x24xf32> -> vector<256x24xf32>
    %c16_26 = arith.constant 16 : index
    %c0_27 = arith.constant 0 : index
    %22 = vector.load %arg11[%c16_26, %c0_27] : memref<288x36xf32, #tpu.memory_space<vmem>>, vector<256x36xf32>
    %c1 = arith.constant 1 : index
    %c0_28 = arith.constant 0 : index
    %c0_29 = arith.constant 0 : index
    %23 = vector.load %arg7[%c1, %c0_28, %c0_29] : memref<3x36x24xf32, #tpu.memory_space<vmem>>, vector<1x36x24xf32>
    %24 = vector.shape_cast %23 : vector<1x36x24xf32> to vector<36x24xf32>
    %cst_30 = arith.constant dense<0.000000e+00> : vector<256x24xf32>
    %25 = tpu.matmul %22, %24, %cst_30 {dimension_numbers = #tpu.dot_dimension_numbers<[1], [0], [0], [1], [0, 0, 1, 1], [], []>} : vector<256x36xf32>, vector<36x24xf32>, vector<256x24xf32> -> vector<256x24xf32>
    %26 = arith.addf %21, %25 : vector<256x24xf32>
    %c32 = arith.constant 32 : index
    %c0_31 = arith.constant 0 : index
    %27 = vector.load %arg11[%c32, %c0_31] : memref<288x36xf32, #tpu.memory_space<vmem>>, vector<256x36xf32>
    %c2 = arith.constant 2 : index
    %c0_32 = arith.constant 0 : index
    %c0_33 = arith.constant 0 : index
    %28 = vector.load %arg7[%c2, %c0_32, %c0_33] : memref<3x36x24xf32, #tpu.memory_space<vmem>>, vector<1x36x24xf32>
    %29 = vector.shape_cast %28 : vector<1x36x24xf32> to vector<36x24xf32>
    %cst_34 = arith.constant dense<0.000000e+00> : vector<256x24xf32>
    %30 = tpu.matmul %27, %29, %cst_34 {dimension_numbers = #tpu.dot_dimension_numbers<[1], [0], [0], [1], [0, 0, 1, 1], [], []>} : vector<256x36xf32>, vector<36x24xf32>, vector<256x24xf32> -> vector<256x24xf32>
    %31 = arith.addf %26, %30 : vector<256x24xf32>
    %32 = vector.extract_strided_slice %31 {offsets = [0, 0], sizes = [256, 8], strides = [1, 1]} : vector<256x24xf32> to vector<256x8xf32>
    %33 = vector.extract_strided_slice %31 {offsets = [0, 8], sizes = [256, 8], strides = [1, 1]} : vector<256x24xf32> to vector<256x8xf32>
    %34 = vector.extract_strided_slice %31 {offsets = [0, 16], sizes = [256, 8], strides = [1, 1]} : vector<256x24xf32> to vector<256x8xf32>
    %cst_35 = arith.constant 0.000000e+00 : f32
    %35 = vector.broadcast %cst_35 : f32 to vector<1x8xf32>
    %36 = vector.extract_strided_slice %32 {offsets = [0, 0], sizes = [255, 8], strides = [1, 1]} : vector<256x8xf32> to vector<255x8xf32>
    %37 = tpu.concatenate %35, %36 in 0 : vector<1x8xf32>, vector<255x8xf32> -> vector<256x8xf32>
    %c0_36 = arith.constant 0 : index
    %c0_37 = arith.constant 0 : index
    %38 = vector.load %arg9[%c0_36, %c0_37] : memref<256x2xf32, #tpu.memory_space<vmem>>, vector<256x1xf32>
    %39 = vector.broadcast %38 : vector<256x1xf32> to vector<256x8xf32>
    %40 = arith.mulf %37, %39 : vector<256x8xf32>
    %41 = vector.extract_strided_slice %34 {offsets = [1, 0], sizes = [255, 8], strides = [1, 1]} : vector<256x8xf32> to vector<255x8xf32>
    %42 = tpu.concatenate %41, %35 in 0 : vector<255x8xf32>, vector<1x8xf32> -> vector<256x8xf32>
    %c0_38 = arith.constant 0 : index
    %c1_39 = arith.constant 1 : index
    %43 = vector.load %arg9[%c0_38, %c1_39] : memref<256x2xf32, #tpu.memory_space<vmem>>, vector<256x1xf32>
    %44 = vector.broadcast %43 : vector<256x1xf32> to vector<256x8xf32>
    %45 = arith.mulf %42, %44 : vector<256x8xf32>
    %46 = arith.addf %33, %40 : vector<256x8xf32>
    %47 = arith.addf %46, %45 : vector<256x8xf32>
    %c0_40 = arith.constant 0 : index
    %c0_41 = arith.constant 0 : index
    %48 = vector.load %arg8[%c0_40, %c0_41] : memref<1x8xf32, #tpu.memory_space<vmem>>, vector<1x8xf32>
    %49 = vector.broadcast %48 : vector<1x8xf32> to vector<256x8xf32>
    %50 = arith.addf %47, %49 : vector<256x8xf32>
    %cst_42 = arith.constant 0.000000e+00 : f32
    %51 = vector.broadcast %cst_42 : f32 to vector<256x120xf32>
    %52 = tpu.concatenate %50, %51 in 1 : vector<256x8xf32>, vector<256x120xf32> -> vector<256x128xf32>
    %c0_43 = arith.constant 0 : index
    %c0_44 = arith.constant 0 : index
    %c0_45 = arith.constant 0 : index
    %53 = vector.load %arg10[%c0_43, %c0_44, %c0_45] : memref<1x256x128xf32, #tpu.memory_space<vmem>>, vector<1x256x128xf32>
    %54 = vector.shape_cast %53 : vector<1x256x128xf32> to vector<256x128xf32>
    %55 = vector.shape_cast %52 : vector<256x128xf32> to vector<1x256x128xf32>
    tpu.vector_store %arg10[%c0_43, %c0_44, %c0_45], %55 {strides = array<i32>} : memref<1x256x128xf32, #tpu.memory_space<vmem>>, vector<1x256x128xf32>,
    return
  }
  func.func @transform_0(%arg0: i32) -> (i32, i32, i32) {
    %c0_i32 = arith.constant 0 : i32
    %c0_i32_0 = arith.constant 0 : i32
    %c0_i32_1 = arith.constant 0 : i32
    return %arg0, %c0_i32, %c0_i32_0 : i32, i32, i32
  }
  func.func @transform_1(%arg0: i32) -> (i32, i32) {
    %c0_i32 = arith.constant 0 : i32
    %c0_i32_0 = arith.constant 0 : i32
    %c0_i32_1 = arith.constant 0 : i32
    return %c0_i32, %c0_i32_0 : i32, i32
  }
  func.func @transform_2(%arg0: i32) -> (i32, i32) {
    %c0_i32 = arith.constant 0 : i32
    %c0_i32_0 = arith.constant 0 : i32
    %c0_i32_1 = arith.constant 0 : i32
    return %c0_i32, %c0_i32_0 : i32, i32
  }
  func.func @transform_3(%arg0: i32) -> (i32, i32) {
    %c0_i32 = arith.constant 0 : i32
    %c0_i32_0 = arith.constant 0 : i32
    %c0_i32_1 = arith.constant 0 : i32
    return %c0_i32, %c0_i32_0 : i32, i32
  }
  func.func @transform_4(%arg0: i32) -> (i32, i32) {
    %c0_i32 = arith.constant 0 : i32
    %c0_i32_0 = arith.constant 0 : i32
    %c0_i32_1 = arith.constant 0 : i32
    return %c0_i32, %c0_i32_0 : i32, i32
  }
  func.func @transform_5(%arg0: i32) -> (i32, i32) {
    %c0_i32 = arith.constant 0 : i32
    %c0_i32_0 = arith.constant 0 : i32
    %c0_i32_1 = arith.constant 0 : i32
    return %c0_i32, %c0_i32_0 : i32, i32
  }
  func.func @transform_6(%arg0: i32) -> (i32, i32, i32) {
    %c0_i32 = arith.constant 0 : i32
    %c0_i32_0 = arith.constant 0 : i32
    %c0_i32_1 = arith.constant 0 : i32
    %c0_i32_2 = arith.constant 0 : i32
    return %c0_i32, %c0_i32_0, %c0_i32_1 : i32, i32, i32
  }
  func.func @transform_7(%arg0: i32) -> (i32, i32) {
    %c0_i32 = arith.constant 0 : i32
    %c0_i32_0 = arith.constant 0 : i32
    %c0_i32_1 = arith.constant 0 : i32
    return %c0_i32, %c0_i32_0 : i32, i32
  }
  func.func @transform_8(%arg0: i32) -> (i32, i32) {
    %c0_i32 = arith.constant 0 : i32
    %c0_i32_0 = arith.constant 0 : i32
    %c0_i32_1 = arith.constant 0 : i32
    return %c0_i32, %c0_i32_0 : i32, i32
  }
  func.func @transform_9(%arg0: i32) -> (i32, i32, i32) {
    %c0_i32 = arith.constant 0 : i32
    %c0_i32_0 = arith.constant 0 : i32
    %c0_i32_1 = arith.constant 0 : i32
    return %arg0, %c0_i32, %c0_i32_0 : i32, i32, i32
  }
}

</mosaic_0001>

<bundles_post_ra>
// kernel: tpu_custom_call.1
= control target key start
LH: loop header
LB: loop body
LE: loop exit
PB: predicated region body
PF: predicated region fallthrough
CT: control target
= control target key end

     0   :  { %14 = vsyncpa [#allocation4], 0  ;;  %s4914_s0 = inlined_call_operand.vmem [shape: f32[2,256,4], index: 0, kind: input, shape index: {}]   ;;  %s4915_s1 = inlined_call_operand.vmem [shape: f32[56,256], index: 1, kind: input, shape index: {}]   ;;  %s4916_s2 = inlined_call_operand.vmem [shape: f32[256,56], index: 2, kind: input, shape index: {}]   ;;  %s4917_s3 = inlined_call_operand.vmem [shape: f32[4,32], index: 3, kind: input, shape index: {}]   ;;  %s4918_s4 = inlined_call_operand.vmem [shape: f32[56,32], index: 4, kind: input, shape index: {}]   ;;  %s4919_s5 = inlined_call_operand.vmem [shape: f32[56,32], index: 5, kind: input, shape index: {}]   ;;  %s4920_s6 = inlined_call_operand.vmem [shape: f32[3,36,24], index: 6, kind: input, shape index: {}]   ;;  %s4921_s7 = inlined_call_operand.vmem [shape: f32[1,8], index: 7, kind: input, shape index: {}]   ;;  %s4922_s8 = inlined_call_operand.vmem [shape: f32[256,2], index: 8, kind: input, shape index: {}]   ;;  %s4923_s9 = inlined_call_operand.hbm [shape: f32[2,256,128], index: 9, kind: output, shape index: {}]  }
   0x1   :  { %16 = vsyncpa [#allocation4 + $0x1], 0  ;;  %s3233_s30 = smov 0   ;;  %s3235_s10 = smov 0  }
   0x2   :  { %s3237_s11 = smov 0   ;;  %s3239_s12 = smov 0  }
   0x3 LB: > { %s3254_s13 = sadd.s32 4294967295, %s3174_s12   ;;  %s2886_s14 = sadd.s32 4294967294, %s3174_s12   ;;  %s3174_s12 = sphi %s3239_s12, %s4949_s12   ;;  %s3170_s11 = sphi %s3237_s11, %s4948_s11   ;;  %s3166_s10 = sphi %s3235_s10, %s4947_s10   ;;  %s3162_s30 = sphi %s3233_s30, %s4946_s30  }
   0x4   : > { %s3258_s15 = sadd.s32 1, %s3174_s12   ;;  %s223_s16 = sadd.s32 1, %s3170_s11 }
   0x5   : > { %s220_s17 = ssub.s32 %s3174_s12, %s3258_s15  ;;  %p233_p0 = scmp.ne.s32.totalorder %s3170_s11, %s3166_s10 }
   0x6   : > { %p221_p1 = scmp.eq.s32.totalorder %s220_s17, 0  ;;  %p234_p2 = scmp.eq.s32.totalorder %s3254_s13, 1 }
   0x7   : > { %p239_p3 = scmp.ne.s32.totalorder %s3166_s10, %s3162_s30  ;;  %p240_p4 = scmp.eq.s32.totalorder %s2886_s14, 1 }
   0x8   : > { %s3269_s18 = scalar_select %p221_p1, %s3170_s11, %s223_s16  }
   0x9   : > { %p3271_p5 = por %p234_p2, %p233_p0  ;;  %p3275_p6 = por %p240_p4, %p239_p3 }
   0xa   : > { %p2889_p7 = scmp.ge.s32.totalorder %s3174_s12, 1  ;;  %p290_p8 = scmp.lt.s32.totalorder %s3174_s12, 3 }
   0xc   : > { %p291_p9 = pnand %p2889_p7, %p290_p8 }
   0xe   : > { %294 = sbr.rel (%p291_p9) target bundleno = 1166 (0x48e), region = 56 }
  0x13   : > { %p326_p10 = scmp.lt.s32.totalorder %s3254_s13, 1  ;;  %v363_v32 = vld [vmem:[%s4915_s1] sm:$0xff]  ;;  %v364_v33 = vld [vmem:[%s4915_s1 + $0x8] sm:$0xff]  ;;  %v365_v34 = vld [vmem:[%s4915_s1 + $0x10] sm:$0xff]  ;;  %vm476_vm0 = vcmask 1043456   ;;  %vm454_vm1 = vcmask 31744  }
  0x14   : > { %v366_v35 = vld [vmem:[%s4915_s1 + $0x18] sm:$0xff]  ;;  %v367_v36 = vld [vmem:[%s4915_s1 + $0x20] sm:$0xff]  ;;  %v368_v37 = vld [vmem:[%s4915_s1 + $0x28] sm:$0xff]  ;;  %s3176_s17 = smov 32   ;;  %vm578_vm2 = vcmask 457728   ;;  %vm949_vm3 = vcmask 293888  }
  0x15   : > { %s327_s21 = scalar_select %p326_p10, %s3254_s13, 1  ;;  %v369_v38 = vld [vmem:[%s4915_s1 + $0x30] sm:$0xff]  ;;  %v370_v39 = vld [vmem:[%s4915_s1 + $0x38] sm:$0xff]  ;;  %v371_v40 = vld [vmem:[%s4915_s1 + $0x40] sm:$0xff]  ;;  %vm916_vm4 = vcmask 261120   ;;  %vm1679_vm5 = vcmask 1040384  }
  0x16   : > { %v372_v41 = vld [vmem:[%s4915_s1 + $0x48] sm:$0xff]  ;;  %v373_v42 = vld [vmem:[%s4915_s1 + $0x50] sm:$0xff]  ;;  %v374_v43 = vld [vmem:[%s4915_s1 + $0x58] sm:$0xff]  ;;  %s3180_s29 = smov 8   ;;  %vm2000_vm6 = vcmask 1046528   ;;  %s3181_s14 = smov 120  }
  0x17   : > { %s3047_s22 = sshll.u32 %s327_s21, 8  ;;  %v375_v44 = vld [vmem:[%s4915_s1 + $0x60] sm:$0xff]  ;;  %v376_v45 = vld [vmem:[%s4915_s1 + $0x68] sm:$0xff]  ;;  %s323_s16 = sand.u32 1, %s3166_s10   ;;  %vm2743_vm7 = vcmask 64512  }
  0x18   : > { %s3286_s25 = scalar_lea.vmem %s4914_s0, %s3047_s22  ;;  %v453_v46 = vld [vmem:[%s4917_s3] sm:$0xf]  ;;  %s3048_s22 = sshll.u32 %s3254_s13, 8 }
  0x19   : > { %v3289_v0 = vld [vmem:[%s3286_s25 + $0x78] sm:$0xff]  ;;  %v3295_v2 = vld [vmem:[%s3286_s25 + $0x70] sm:$0xff]  ;;  %v3303_v4 = vld [vmem:[%s3286_s25 + $0x68] sm:$0xff]  ;;  %2893 = vmatpush.msk.msra.mxu2 %vm476_vm0, %v453_v46  ;;  %s2809_s28 = scalar_lea.sflag [#allocation4], %s323_s16 }
  0x1a   : > { %v3292_v1 = vld [vmem:[%s3286_s25 + $0xf8] sm:$0xff]  ;;  %377 = vmatpush.msra.mxu0 %v3289_v0  ;;  %v3300_v3 = vld [vmem:[%s3286_s25 + $0xf0] sm:$0xff]  ;;  %v3306_v5 = vld [vmem:[%s3286_s25 + $0xe8] sm:$0xff] }
  0x1b   : > { %415 = vmatpush.msra.mxu1 %v3292_v1  ;;  %v3311_v6 = vld [vmem:[%s3286_s25 + $0x60] sm:$0xff]  ;;  %v3319_v8 = vld [vmem:[%s3286_s25 + $0x58] sm:$0xff]  ;;  %v3327_v10 = vld [vmem:[%s3286_s25 + $0x50] sm:$0xff] }
  0x1c   : > { %378 = vmatpush.msra.mxu0 %v3295_v2  ;;  %v3314_v7 = vld [vmem:[%s3286_s25 + $0xe0] sm:$0xff]  ;;  %v3322_v9 = vld [vmem:[%s3286_s25 + $0xd8] sm:$0xff]  ;;  %v3330_v11 = vld [vmem:[%s3286_s25 + $0xd0] sm:$0xff] }
  0x1d   : > { %416 = vmatpush.msra.mxu1 %v3300_v3  ;;  %v3335_v12 = vld [vmem:[%s3286_s25 + $0x48] sm:$0xff]  ;;  %v3343_v14 = vld [vmem:[%s3286_s25 + $0x40] sm:$0xff]  ;;  %v3351_v16 = vld [vmem:[%s3286_s25 + $0x38] sm:$0xff] }
  0x1e   : > { %379 = vmatpush.msra.mxu0 %v3303_v4  ;;  %v3338_v13 = vld [vmem:[%s3286_s25 + $0xc8] sm:$0xff]  ;;  %v3346_v15 = vld [vmem:[%s3286_s25 + $0xc0] sm:$0xff]  ;;  %v3354_v17 = vld [vmem:[%s3286_s25 + $0xb8] sm:$0xff] }
  0x1f   : > { %417 = vmatpush.msra.mxu1 %v3306_v5  ;;  %v3359_v18 = vld [vmem:[%s3286_s25 + $0x30] sm:$0xff]  ;;  %v3367_v20 = vld [vmem:[%s3286_s25 + $0x28] sm:$0xff]  ;;  %v3375_v22 = vld [vmem:[%s3286_s25 + $0x20] sm:$0xff] }
  0x20   : > { %380 = vmatpush.msra.mxu0 %v3311_v6  ;;  %v3362_v19 = vld [vmem:[%s3286_s25 + $0xb0] sm:$0xff]  ;;  %v3370_v21 = vld [vmem:[%s3286_s25 + $0xa8] sm:$0xff]  ;;  %v3378_v23 = vld [vmem:[%s3286_s25 + $0xa0] sm:$0xff]  ;;  %828 = vrot.lane.b32.xlu2 %v3375_v22, %s3176_s17 }
  0x21   : > { %418 = vmatpush.msra.mxu1 %v3314_v7  ;;  %v3383_v24 = vld [vmem:[%s3286_s25 + $0x18] sm:$0xff]  ;;  %v333_v26 = vld [vmem:[%s3286_s25 + $0x10] sm:$0xff]  ;;  %v3397_v28 = vld [vmem:[%s3286_s25 + $0x8] sm:$0xff] }
  0x22   : > { %381 = vmatpush.msra.mxu0 %v3319_v8  ;;  %v3386_v25 = vld [vmem:[%s3286_s25 + $0x98] sm:$0xff]  ;;  %v3392_v27 = vld [vmem:[%s3286_s25 + $0x90] sm:$0xff]  ;;  %v3400_v29 = vld [vmem:[%s3286_s25 + $0x88] sm:$0xff]  ;;  %824 = vrot.lane.b32.xlu1 %v333_v26, %s3176_s17 }
  0x23   : > { %419 = vmatpush.msra.mxu1 %v3322_v9  ;;  %v331_v30 = vld [vmem:[%s3286_s25] sm:$0xff] }
  0x24   : > { %382 = vmatpush.msra.mxu0 %v3327_v10  ;;  %v3405_v31 = vld [vmem:[%s3286_s25 + $0x80] sm:$0xff]  ;;  %820 = vrot.lane.b32.xlu0 %v331_v30, %s3176_s17  ;;  %s2820_s25 = scalar_lea.hbm %s4923_s9, %s3048_s22  ;;  %s3132_s22 = scalar_lea.hbm %s4923_s9, 512 }
  0x25   : > { %420 = vmatpush.msra.mxu1 %v3330_v11  ;;  %v3599_v46 = vld [vmem:[%s4922_s8 + $0x20] sm:$0xff]  ;;  %s2823_s27 = sshll.u32 %s2820_s25, 4  ;;  %s2824_s27 = int_to_ptr.hbm [resolvable:$true] %s2823_s27 }
  0x26   : > { %383 = vmatpush.msra.mxu0 %v3335_v12  ;;  %s3126_s13 = sshra.s32 %s2824_s27, 4  ;;  %s3127_s13 = int_to_ptr.hbm [resolvable:$true] %s3126_s13 }
  0x27   : > { %421 = vmatpush.msra.mxu1 %v3338_v13  ;;  %p3133_p0 = scmp.lt.s32.totalorder %s3127_s13, %s4923_s9 }
  0x28   : > { %384 = vmatpush.msra.mxu0 %v3343_v14  ;;  %830 = vrot.lane.b32.xlu2 %v3367_v20, %s3176_s17 }
  0x29   : > { %422 = vmatpush.msra.mxu1 %v3346_v15 }
  0x2a   : > { %385 = vmatpush.msra.mxu0 %v3351_v16  ;;  %826 = vrot.lane.b32.xlu1 %v3383_v24, %s3176_s17 }
  0x2b   : > { %423 = vmatpush.msra.mxu1 %v3354_v17 }
  0x2c   : > { %386 = vmatpush.msra.mxu0 %v3359_v18  ;;  %822 = vrot.lane.b32.xlu0 %v3397_v28, %s3176_s17 }
  0x2d   : > { %424 = vmatpush.msra.mxu1 %v3362_v19 }
  0x2e   : > { %387 = vmatpush.msra.mxu0 %v3367_v20 }
  0x2f   : > { %425 = vmatpush.msra.mxu1 %v3370_v21 }
  0x30   : > { %388 = vmatpush.msra.mxu0 %v3375_v22  ;;  %836 = vrot.lane.b32.xlu2 %v3343_v14, %s3176_s17  ;;  %v537_v14 = vld [vmem:[%s4919_s5 + $0x28] sm:$0xff] }
  0x31   : > { %426 = vmatpush.msra.mxu1 %v3378_v23 }
  0x32   : > { %389 = vmatpush.msra.mxu0 %v3383_v24  ;;  %834 = vrot.lane.b32.xlu1 %v3351_v16, %s3176_s17 }
  0x33   : > { %427 = vmatpush.msra.mxu1 %v3386_v25 }
  0x34   : > { %390 = vmatpush.msra.mxu0 %v333_v26  ;;  %832 = vrot.lane.b32.xlu0 %v3359_v18, %s3176_s17  ;;  %v536_v18 = vld [vmem:[%s4919_s5 + $0x20] sm:$0xff] }
  0x35   : > { %428 = vmatpush.msra.mxu1 %v3392_v27 }
  0x36   : > { %391 = vmatpush.msra.mxu0 %v3397_v28 }
  0x37   : > { %429 = vmatpush.msra.mxu1 %v3400_v29 }
  0x38   : > { %392 = vmatpush.msra.mxu0 %v331_v30  ;;  %842 = vrot.lane.b32.xlu2 %v3319_v8, %s3176_s17  ;;  %v534_v30 = vld [vmem:[%s4919_s5 + $0x10] sm:$0xff] }
  0x39   : > { %430 = vmatpush.msra.mxu1 %v3405_v31  ;;  %393 = vmatmul.f32.vlgmr.msra.gmra.mxu0 %v363_v32 }
  0x3a   : > { %431 = vmatmul.f32.vlgmr.msra.gmra.mxu1 %v364_v33  ;;  %840 = vrot.lane.b32.xlu1 %v3327_v10, %s3176_s17  ;;  %v533_v33 = vld [vmem:[%s4919_s5 + $0x8] sm:$0xff] }
  0x3c   : > { %838 = vrot.lane.b32.xlu0 %v3335_v12, %s3176_s17 }
  0x40   : > { %848 = vrot.lane.b32.xlu2 %v3295_v2, %s3176_s17 }
  0x41   : > { %396 = vmatmul.f32.gmra.mxu0 %v365_v34 }
  0x42   : > { %434 = vmatmul.f32.gmra.mxu1 %v366_v35  ;;  %846 = vrot.lane.b32.xlu1 %v3303_v4, %s3176_s17 }
  0x44   : > { %844 = vrot.lane.b32.xlu0 %v3311_v6, %s3176_s17 }
  0x48   : > { %854 = vrot.lane.b32.xlu2 %v3400_v29, %s3176_s17  ;;  %v518_v29 = vld [vmem:[%s4918_s4] sm:$0xff] }
  0x49   : > { %399 = vmatmul.f32.gmra.mxu0 %v367_v36  ;;  %v532_v36 = vld [vmem:[%s4919_s5] sm:$0xff] }
  0x4a   : > { %437 = vmatmul.f32.gmra.mxu1 %v368_v37  ;;  %852 = vrot.lane.b32.xlu1 %v3405_v31, %s3176_s17 }
  0x4c   : > { %850 = vrot.lane.b32.xlu0 %v3289_v0, %s3176_s17 }
  0x50   : > { %860 = vrot.lane.b32.xlu2 %v3378_v23, %s3176_s17  ;;  %v519_v23 = vld [vmem:[%s4918_s4 + $0x8] sm:$0xff] }
  0x51   : > { %402 = vmatmul.f32.gmra.mxu0 %v369_v38 }
  0x52   : > { %440 = vmatmul.f32.gmra.mxu1 %v370_v39  ;;  %858 = vrot.lane.b32.xlu1 %v3386_v25, %s3176_s17  ;;  %v535_v25 = vld [vmem:[%s4919_s5 + $0x18] sm:$0xff]  ;;  %v546_v39 = vld [vmem:[%s4916_s2] sm:$0xff] }
  0x54   : > { %856 = vrot.lane.b32.xlu0 %v3392_v27, %s3176_s17 }
  0x58   : > { %866 = vrot.lane.b32.xlu2 %v3354_v17, %s3176_s17  ;;  %v520_v17 = vld [vmem:[%s4918_s4 + $0x10] sm:$0xff] }
  0x59   : > { %405 = vmatmul.f32.gmra.mxu0 %v371_v40  ;;  %v547_v40 = vld [vmem:[%s4916_s2 + $0x8] sm:$0xff] }
  0x5a   : > { %443 = vmatmul.f32.gmra.mxu1 %v372_v41  ;;  %864 = vrot.lane.b32.xlu1 %v3362_v19, %s3176_s17  ;;  %v3578_v41 = vld [vmem:[%s4922_s8] sm:$0xff] }
  0x5c   : > { %862 = vrot.lane.b32.xlu0 %v3370_v21, %s3176_s17 }
  0x60   : > { %872 = vrot.lane.b32.xlu2 %v3330_v11, %s3176_s17 }
  0x61   : > { %408 = vmatmul.f32.gmra.mxu0 %v373_v42  ;;  %v3583_v42 = vld [vmem:[%s4922_s8 + $0x10] sm:$0xff] }
  0x62   : > { %446 = vmatmul.f32.gmra.mxu1 %v374_v43  ;;  %870 = vrot.lane.b32.xlu1 %v3338_v13, %s3176_s17  ;;  %v521_v13 = vld [vmem:[%s4918_s4 + $0x18] sm:$0xff]  ;;  %v3177_v43 = vmov 0  }
  0x63   : > { %3107 = vset.pattern.permute.xlu1 %v3177_v43  ;;  %3105 = vset.pattern.permute.xlu2 %v3177_v43 }
  0x64   : > { %868 = vrot.lane.b32.xlu0 %v3346_v15, %s3176_s17 }
  0x65   : > { %3106 = vset.pattern.permute.xlu0 %v3177_v43 }
  0x68   : > { %878 = vrot.lane.b32.xlu2 %v3306_v5, %s3176_s17  ;;  %v524_v5 = vld [vmem:[%s4918_s4 + $0x30] sm:$0xff] }
  0x69   : > { %411 = vmatmul.f32.gmra.mxu0 %v375_v44  ;;  %v548_v44 = vld [vmem:[%s4916_s2 + $0x10] sm:$0xff] }
  0x6a   : > { %449 = vmatmul.f32.gmra.mxu1 %v376_v45  ;;  %876 = vrot.lane.b32.xlu1 %v3314_v7, %s3176_s17  ;;  %v523_v7 = vld [vmem:[%s4918_s4 + $0x28] sm:$0xff]  ;;  %v3594_v45 = vld [vmem:[%s4922_s8 + $0x18] sm:$0xff] }
  0x6c   : > { %874 = vrot.lane.b32.xlu0 %v3322_v9, %s3176_s17 }
  0x70   : > { %1810 = vperm.xlu2 %3105, %v3578_v41  }
  0x72   : > { %882 = vrot.lane.b32.xlu1 %v3292_v1, %s3176_s17  ;;  %v522_v1 = vld [vmem:[%s4918_s4 + $0x20] sm:$0xff] }
  0x74   : > { %880 = vrot.lane.b32.xlu0 %v3300_v3, %s3176_s17  ;;  %v538_v3 = vld [vmem:[%s4919_s5 + $0x30] sm:$0xff]  ;;  %s2890_s17 = sshll.u32 %s323_s16, 8 }
  0x75   : > { %s4709_s21 = scalar_lea.vmem [#allocation3], %s2890_s17 }
  0x76   : > { %s2821_s26 = sshll.u32 %s4709_s21, 4  ;;  %s2822_s26 = int_to_ptr.vmem [resolvable:$true] %s2821_s26 }
  0x78   : > { %1825 = vperm.xlu2 %3105, %v3594_v45  }
  0x7a   : > { %1820 = vperm.xlu1 %3107, %v3583_v42  }
  0x82   : > { %1830 = vperm.xlu1 %3107, %v3599_v46  }
  0xb6   : > { %v394_v47 = vpop.f32.mrf.mxu0 }
  0xb7   : > { %v432_v48 = vpop.f32.mrf.mxu1 }
  0xb8   : > { %v433_v49 = vadd.f32 %v432_v48, %v394_v47  ;;  %v549_v47 = vld [vmem:[%s4916_s2 + $0x18] sm:$0xff]  ;;  %v3610_v48 = vld [vmem:[%s4922_s8 + $0x28] sm:$0xff] }
  0xb9   : > { %1835 = vperm.xlu2 %3105, %v3610_v48  }
  0xba   : > { %2894 = vmatmul.msk.f32.vlgmr.msra.gmra.mxu2 %vm454_vm1, %v433_v49  ;;  %v3615_v49 = vld [vmem:[%s4922_s8 + $0x38] sm:$0xff] }
  0xbb   : > { %1845 = vperm.xlu1 %3107, %v3615_v49  }
  0xbe   : > { %v397_v50 = vpop.f32.mrf.mxu0 }
  0xbf   : > { %v435_v51 = vpop.f32.mrf.mxu1 }
  0xc0   : > { %v436_v52 = vadd.f32 %v435_v51, %v397_v50  ;;  %v550_v50 = vld [vmem:[%s4916_s2 + $0x20] sm:$0xff] }
  0xc1   : > { %v3626_v51 = vld [vmem:[%s4922_s8 + $0x40] sm:$0xff] }
  0xc2   : > { %2895 = vmatmul.msk.f32.gmra.mxu2 %vm454_vm1, %v436_v52  ;;  %v3631_v52 = vld [vmem:[%s4922_s8 + $0x50] sm:$0xff]  ;;  %1850 = vperm.xlu2 %3105, %v3626_v51  }
  0xc3   : > { %1860 = vperm.xlu1 %3107, %v3631_v52  }
  0xc6   : > { %v400_v53 = vpop.f32.mrf.mxu0 }
  0xc7   : > { %v438_v54 = vpop.f32.mrf.mxu1 }
  0xc8   : > { %v439_v55 = vadd.f32 %v438_v54, %v400_v53  ;;  %v551_v53 = vld [vmem:[%s4916_s2 + $0x28] sm:$0xff] }
  0xc9   : > { %v3642_v54 = vld [vmem:[%s4922_s8 + $0x8] sm:$0xff] }
  0xca   : > { %2896 = vmatmul.msk.f32.gmra.mxu2 %vm454_vm1, %v439_v55  ;;  %v3647_v55 = vld [vmem:[%s4922_s8 + $0x58] sm:$0xff]  ;;  %1815 = vperm.xlu0 %3106, %v3642_v54  }
  0xcb   : > { %1865 = vperm.xlu2 %3105, %v3647_v55  }
  0xce   : > { %v403_v56 = vpop.f32.mrf.mxu0 }
  0xcf   : > { %v441_v57 = vpop.f32.mrf.mxu1 }
  0xd0   : > { %v442_v58 = vadd.f32 %v441_v57, %v403_v56  ;;  %v3652_v56 = vld [vmem:[%s4922_s8 + $0x68] sm:$0xff]  ;;  %v552_v57 = vld [vmem:[%s4916_s2 + $0x30] sm:$0xff] }
  0xd1   : > { %1875 = vperm.xlu1 %3107, %v3652_v56  }
  0xd2   : > { %2897 = vmatmul.msk.f32.gmra.mxu2 %vm454_vm1, %v442_v58  ;;  %v3664_v58 = vld [vmem:[%s4922_s8 + $0x30] sm:$0xff] }
  0xd3   : > { %1840 = vperm.xlu0 %3106, %v3664_v58  }
  0xd6   : > { %v406_v59 = vpop.f32.mrf.mxu0 }
  0xd7   : > { %v444_v60 = vpop.f32.mrf.mxu1 }
  0xd8   : > { %v445_v61 = vadd.f32 %v444_v60, %v406_v59  ;;  %v3669_v59 = vld [vmem:[%s4922_s8 + $0x70] sm:$0xff]  ;;  %v3674_v60 = vld [vmem:[%s4922_s8 + $0x80] sm:$0xff] }
  0xd9   : > { %1880 = vperm.xlu2 %3105, %v3669_v59   ;;  %1890 = vperm.xlu1 %3107, %v3674_v60  }
  0xda   : > { %2898 = vmatmul.msk.f32.gmra.mxu2 %vm454_vm1, %v445_v61  ;;  %v553_v61 = vld [vmem:[%s4916_s2 + $0x38] sm:$0xff] }
  0xde   : > { %v409_v62 = vpop.f32.mrf.mxu0 }
  0xdf   : > { %v447_v63 = vpop.f32.mrf.mxu1 }
  0xe0   : > { %v448_v22 = vadd.f32 %v447_v63, %v409_v62  ;;  %v3686_v62 = vld [vmem:[%s4922_s8 + $0x48] sm:$0xff] }
  0xe1   : > { %v3691_v63 = vld [vmem:[%s4922_s8 + $0x88] sm:$0xff]  ;;  %1855 = vperm.xlu0 %3106, %v3686_v62  }
  0xe2   : > { %2899 = vmatmul.msk.f32.gmra.mxu2 %vm454_vm1, %v448_v22  ;;  %v3696_v22 = vld [vmem:[%s4922_s8 + $0x98] sm:$0xff]  ;;  %1895 = vperm.xlu2 %3105, %v3691_v63  }
  0xe3   : > { %1905 = vperm.xlu1 %3107, %v3696_v22  }
  0xe6   : > { %v412_v20 = vpop.f32.mrf.mxu0 }
  0xe7   : > { %v450_v24 = vpop.f32.mrf.mxu1 }
  0xe8   : > { %v451_v26 = vadd.f32 %v450_v24, %v412_v20  ;;  %v554_v20 = vld [vmem:[%s4916_s2 + $0x40] sm:$0xff] }
  0xe9   : > { %v3708_v24 = vld [vmem:[%s4922_s8 + $0x60] sm:$0xff] }
  0xea   : > { %2900 = vmatmul.msk.f32.gmra.mxu2 %vm454_vm1, %v451_v26  ;;  %v2937_v26 = vld [vmem:[%s4920_s6 + $0x48] sm:$0xf]  ;;  %1870 = vperm.xlu0 %3106, %v3708_v24  }
  0xeb   : > { %2938 = vmatpush.msk.msrb.mxu2 %vm476_vm0, %v2937_v26  ;;  %v3004_v26 = vld [vmem:[%s4920_s6 + $0x50] sm:$0xff] }
 0x13d   : > { %v497_v0 = vpop.f32.mrf.mxu2 }
 0x13e   : > { %v525_v34 = vmul.f32 %v518_v29, %v497_v0  ;;  %v3716_v0 = vld [vmem:[%s4922_s8 + $0xa0] sm:$0xff] }
 0x13f   : > { %1910 = vperm.xlu2 %3105, %v3716_v0   ;;  %v1018_v29 = vld [vmem:[%s4920_s6] sm:$0xff] }
 0x140   : > { %v539_v38 = vadd.f32 %v532_v36, %v525_v34  ;;  %v3006_v36 = vld [vmem:[%s4920_s6 + $0x60] sm:$0xff] }
 0x145   : > { %v500_v2 = vpop.f32.mrf.mxu2 }
 0x146   : > { %v526_v31 = vmul.f32 %v519_v23, %v500_v2  ;;  %v3723_v2 = vld [vmem:[%s4922_s8 + $0xb0] sm:$0xff]  ;;  %v2935_v23 = vld [vmem:[%s4920_s6 + $0x38] sm:$0xff] }
 0x147   : > { %1920 = vperm.xlu1 %3107, %v3723_v2  }
 0x148   : > { %v540_v37 = vadd.f32 %v533_v33, %v526_v31  ;;  %v3840_v33 = vpop.permute.xlu0 %820 }
 0x14d   : > { %v503_v4 = vpop.f32.mrf.mxu2 }
 0x14e   : > { %v527_v27 = vmul.f32 %v520_v17, %v503_v4  ;;  %v555_v4 = vld [vmem:[%s4916_s2 + $0x48] sm:$0xff]  ;;  %v3795_v17 = vpop.permute.xlu2 %828 }
 0x150   : > { %v541_v35 = vadd.f32 %v534_v30, %v527_v27  ;;  %v3822_v27 = vld [vmem:[%s4922_s8 + $0xe8] sm:$0xff] }
 0x155   : > { %v506_v6 = vpop.f32.mrf.mxu2 }
 0x156   : > { %v528_v19 = vmul.f32 %v521_v13, %v506_v6  ;;  %v3734_v6 = vld [vmem:[%s4922_s8 + $0x78] sm:$0xff]  ;;  %v3842_v34 = vpop.permute.xlu2 %830 }
 0x157   : > { %1885 = vperm.xlu0 %3106, %v3734_v6   ;;  %v1021_v13 = vld [vmem:[%s4920_s6 + $0x18] sm:$0xff] }
 0x158   : > { %v542_v32 = vadd.f32 %v535_v25, %v528_v19  ;;  %v3007_v19 = vld [vmem:[%s4920_s6 + $0x68] sm:$0xff] }
 0x159   : > { %v1019_v25 = vld [vmem:[%s4920_s6 + $0x8] sm:$0xff] }
 0x15d   : > { %v509_v8 = vpop.f32.mrf.mxu2 }
 0x15e   : > { %v529_v15 = vmul.f32 %v522_v1, %v509_v8  ;;  %v1022_v8 = vld [vmem:[%s4920_s6 + $0x20] sm:$0xf] }
 0x15f   : > { %2971 = vmatpush.msk.msrb.mxu0 %vm476_vm0, %v1022_v8  ;;  %v2936_v1 = vld [vmem:[%s4920_s6 + $0x40] sm:$0xff] }
 0x160   : > { %v543_v28 = vadd.f32 %v536_v18, %v529_v15  ;;  %1142 = vmatpush.msrb.mxu2 %v2936_v1  ;;  %v557_v15 = vld [vmem:[%s4916_s2 + $0x58] sm:$0xff]  ;;  %v1020_v18 = vld [vmem:[%s4920_s6 + $0x10] sm:$0xff] }
 0x161   : > { %1264 = vmatpush.msrb.mxu0 %v1021_v13 }
 0x162   : > { %1143 = vmatpush.msrb.mxu2 %v2935_v23 }
 0x163   : > { %1265 = vmatpush.msrb.mxu0 %v1020_v18 }
 0x165   : > { %v512_v10 = vpop.f32.mrf.mxu2  ;;  %1266 = vmatpush.msrb.mxu0 %v1019_v25 }
 0x166   : > { %v530_v11 = vmul.f32 %v523_v7, %v512_v10  ;;  %v3742_v10 = vld [vmem:[%s4922_s8 + $0xb8] sm:$0xff]  ;;  %v3749_v7 = vld [vmem:[%s4922_s8 + $0xc8] sm:$0xff] }
 0x167   : > { %1925 = vperm.xlu2 %3105, %v3742_v10   ;;  %1935 = vperm.xlu1 %3107, %v3749_v7  }
 0x168   : > { %v544_v21 = vadd.f32 %v537_v14, %v530_v11  ;;  %v3776_v11 = vld [vmem:[%s4922_s8 + $0xd0] sm:$0xff]  ;;  %v3787_v14 = vpop.permute.xlu1 %824  ;;  %1267 = vmatpush.msrb.mxu0 %v1018_v29 }
 0x16d   : > { %v515_v9 = vpop.f32.mrf.mxu2 }
 0x16e   : > { %v531_v12 = vmul.f32 %v524_v5, %v515_v9  ;;  %v3754_v5 = vld [vmem:[%s4920_s6 + $0x70] sm:$0xf] }
 0x16f   : > { %3009 = vmatpush.msk.msrb.mxu1 %vm476_vm0, %v3754_v5  ;;  %v556_v9 = vld [vmem:[%s4916_s2 + $0x50] sm:$0xff]  ;;  %1940 = vperm.xlu2 %3105, %v3776_v11  }
 0x170   : > { %v545_v16 = vadd.f32 %v538_v3, %v531_v12  ;;  %v3771_v3 = vld [vmem:[%s4922_s8 + $0x90] sm:$0xff]  ;;  %v3781_v12 = vld [vmem:[%s4922_s8 + $0xe0] sm:$0xff]  ;;  %v3834_v30 = vpop.permute.xlu1 %826 }
 0x171   : > { %1900 = vperm.xlu0 %3106, %v3771_v3   ;;  %1950 = vperm.xlu1 %3107, %v3781_v12  }
 0x172   : > { %684 = vmatpush.msra.mxu3 %v545_v16  ;;  %v3178_v16 = vmov 0.0   ;;  %1514 = vmatpush.msrb.mxu1 %v3007_v19 }
 0x173   : > { %950 = vst.msk [vmem:[#allocation2] sm:$0xff] %vm949_vm3, %v3178_v16 }
 0x174   : > { %685 = vmatpush.msra.mxu3 %v544_v21  ;;  %951 = vst.msk [vmem:[#allocation2 + $0x8] sm:$0xff] %vm949_vm3, %v3178_v16  ;;  %v3809_v21 = vld [vmem:[%s4922_s8 + $0xa8] sm:$0xff]  ;;  %1515 = vmatpush.msrb.mxu1 %v3006_v36 }
 0x175   : > { %952 = vst.msk [vmem:[#allocation2 + $0x110] sm:$0xff] %vm949_vm3, %v3178_v16 }
 0x176   : > { %686 = vmatpush.msra.mxu3 %v543_v28  ;;  %953 = vst.msk [vmem:[#allocation2 + $0x118] sm:$0xff] %vm949_vm3, %v3178_v16  ;;  %v3827_v28 = vld [vmem:[%s4922_s8 + $0xf8] sm:$0xff] }
 0x177   : > { %1955 = vperm.xlu2 %3105, %v3822_v27  }
 0x178   : > { %687 = vmatpush.msra.mxu3 %v542_v32  ;;  %v558_v32 = vld [vmem:[%s4916_s2 + $0x60] sm:$0xff]  ;;  %v3865_v43 = vpop.permute.xlu1 %834 }
 0x179   : > { %1915 = vperm.xlu0 %3106, %v3809_v21   ;;  %1965 = vperm.xlu1 %3107, %v3827_v28  }
 0x17a   : > { %688 = vmatpush.msra.mxu3 %v541_v35  ;;  %v986_v31 = vld [vmem:[#allocation2] sm:$0xff] }
 0x17b   : > { %2972 = vmatmul.msk.f32.vlgmr.msrb.gmra.mxu0 %vm949_vm3, %v986_v31  ;;  %v3848_v35 = vld [vmem:[%s4922_s8 + $0xc0] sm:$0xff] }
 0x17c   : > { %689 = vmatpush.msra.mxu3 %v540_v37  ;;  %v3179_v37 = vmov 1  }
 0x17e   : > { %690 = vmatpush.msra.mxu3 %v539_v38  ;;  %v987_v38 = vld [vmem:[#allocation2 + $0x8] sm:$0xff] }
 0x17f   : > { %2901 = vmatmul.msk.f32.vlgmr.msra.gmra.mxu3 %vm578_vm2, %v546_v39  ;;  %3108 = vset.pattern.permute.xlu2 %v3179_v37  ;;  %v559_v39 = vld [vmem:[%s4916_s2 + $0x68] sm:$0xff] }
 0x180   : > { %3049 = vmatpush.msk.msrb.mxu3 %vm476_vm0, %v1022_v8  ;;  %2098 = vperm.xlu2 %3108, %v3578_v41   ;;  %v823_v41 = vpop.permute.xlu0 %822 }
 0x181   : > { %1930 = vperm.xlu0 %3106, %v3848_v35   ;;  %3110 = vset.pattern.permute.xlu1 %v3179_v37 }
 0x182   : > { %3050 = vmatpush.msrb.mxu3 %v1021_v13  ;;  %2106 = vperm.xlu1 %3110, %v3583_v42   ;;  %v3871_v42 = vld [vmem:[%s4922_s8 + $0xd8] sm:$0xff] }
 0x183   : > { %2973 = vmatmul.msk.f32.gmra.mxu0 %vm949_vm3, %v987_v38 }
 0x184   : > { %3051 = vmatpush.msrb.mxu3 %v1020_v18 }
 0x186   : > { %3052 = vmatpush.msrb.mxu3 %v1019_v25 }
 0x187   : > { %2902 = vmatmul.msk.f32.gmra.mxu3 %vm578_vm2, %v547_v40  ;;  %v2934_v40 = vld [vmem:[%s4920_s6 + $0x30] sm:$0xff] }
 0x188   : > { %3053 = vmatpush.msrb.mxu3 %v1018_v29  ;;  %1144 = vmatpush.msrb.mxu2 %v2934_v40 }
 0x189   : > { %1945 = vperm.xlu0 %3106, %v3871_v42   ;;  %2110 = vperm.xlu2 %3108, %v3594_v45   ;;  %v3893_v45 = vld [vmem:[%s4922_s8 + $0xf0] sm:$0xff] }
 0x18a   : > { %3054 = vmatpush.msk.msra.mxu3 %vm476_vm0, %v3754_v5  ;;  %2114 = vperm.xlu1 %3110, %v3599_v46  }
 0x18c   : > { %3055 = vmatpush.msra.mxu3 %v3007_v19 }
 0x18e   : > { %3056 = vmatpush.msra.mxu3 %v3006_v36 }
 0x18f   : > { %2903 = vmatmul.msk.f32.gmra.mxu3 %vm578_vm2, %v548_v44  ;;  %v3874_v44 = vpop.permute.xlu2 %836 }
 0x191   : > { %1960 = vperm.xlu0 %3106, %v3893_v45   ;;  %2118 = vperm.xlu2 %3108, %v3610_v48  }
 0x192   : > { %2126 = vperm.xlu1 %3110, %v3615_v49   ;;  %v562_v49 = vld [vmem:[%s4916_s2 + $0x80] sm:$0xff] }
 0x197   : > { %2904 = vmatmul.msk.f32.gmra.mxu3 %vm578_vm2, %v549_v47  ;;  %v2933_v47 = vld [vmem:[%s4920_s6 + $0x28] sm:$0xff]  ;;  %v3898_v46 = vpop.permute.xlu2 %842 }
 0x198   : > { %1145 = vmatpush.msrb.mxu2 %v2933_v47 }
 0x199   : > { %3109 = vset.pattern.permute.xlu0 %v3179_v37  ;;  %2130 = vperm.xlu2 %3108, %v3626_v51   ;;  %v563_v51 = vld [vmem:[%s4916_s2 + $0x88] sm:$0xff] }
 0x19a   : > { %2102 = vperm.xlu0 %3109, %v3642_v54   ;;  %2138 = vperm.xlu1 %3110, %v3631_v52  }
 0x19f   : > { %2905 = vmatmul.msk.f32.gmra.mxu3 %vm578_vm2, %v550_v50  ;;  %v560_v50 = vld [vmem:[%s4916_s2 + $0x70] sm:$0xff]  ;;  %v3919_v8 = vpop.permute.xlu2 %848 }
 0x1a1   : > { %2142 = vperm.xlu2 %3108, %v3647_v55  }
 0x1a2   : > { %2122 = vperm.xlu0 %3109, %v3664_v58   ;;  %2150 = vperm.xlu1 %3110, %v3652_v56   ;;  %v564_v56 = vld [vmem:[%s4916_s2 + $0x90] sm:$0xff] }
 0x1a7   : > { %2906 = vmatmul.msk.f32.gmra.mxu3 %vm578_vm2, %v551_v53  ;;  %v3005_v53 = vld [vmem:[%s4920_s6 + $0x58] sm:$0xff] }
 0x1a8   : > { %1516 = vmatpush.msrb.mxu1 %v3005_v53  ;;  %3057 = vmatpush.msra.mxu3 %v3005_v53 }
 0x1a9   : > { %2154 = vperm.xlu2 %3108, %v3669_v59  }
 0x1aa   : > { %1517 = vmatpush.msrb.mxu1 %v3004_v26  ;;  %3058 = vmatpush.msra.mxu3 %v3004_v26  ;;  %v571_v26 = vld [vmem:[%s4916_s2 + $0xc8] sm:$0xff] }
 0x1ab   : > { %2134 = vperm.xlu0 %3109, %v3686_v62   ;;  %2162 = vperm.xlu1 %3110, %v3674_v60   ;;  %v565_v60 = vld [vmem:[%s4916_s2 + $0x98] sm:$0xff] }
 0x1af   : > { %2907 = vmatmul.msk.f32.gmra.mxu3 %vm578_vm2, %v552_v57  ;;  %v3887_v57 = vpop.permute.xlu1 %840 }
 0x1b1   : > { %2166 = vperm.xlu2 %3108, %v3691_v63  }
 0x1b3   : > { %2146 = vperm.xlu0 %3109, %v3708_v24   ;;  %2174 = vperm.xlu1 %3110, %v3696_v22   ;;  %v566_v22 = vld [vmem:[%s4916_s2 + $0xa0] sm:$0xff] }
 0x1b7   : > { %2908 = vmatmul.msk.f32.gmra.mxu3 %vm578_vm2, %v553_v61  ;;  %v3896_v61 = vpop.permute.xlu0 %832 }
 0x1b9   : > { %2178 = vperm.xlu2 %3108, %v3716_v0  }
 0x1bb   : > { %2158 = vperm.xlu0 %3109, %v3734_v6   ;;  %2186 = vperm.xlu1 %3110, %v3723_v2   ;;  %v567_v2 = vld [vmem:[%s4916_s2 + $0xa8] sm:$0xff] }
 0x1bf   : > { %2909 = vmatmul.msk.f32.gmra.mxu3 %vm578_vm2, %v554_v20  ;;  %v561_v20 = vld [vmem:[%s4916_s2 + $0x78] sm:$0xff]  ;;  %v3912_v48 = vpop.permute.xlu0 %838 }
 0x1c1   : > { %2190 = vperm.xlu2 %3108, %v3742_v10  }
 0x1c3   : > { %2170 = vperm.xlu0 %3109, %v3771_v3   ;;  %2198 = vperm.xlu1 %3110, %v3749_v7   ;;  %v568_v7 = vld [vmem:[%s4916_s2 + $0xb0] sm:$0xff] }
 0x1c7   : > { %2910 = vmatmul.msk.f32.gmra.mxu3 %vm578_vm2, %v555_v4  ;;  %v3909_v4 = vpop.permute.xlu1 %846  ;;  %v3933_v52 = vpop.permute.xlu0 %844 }
 0x1c9   : > { %2202 = vperm.xlu2 %3108, %v3776_v11  }
 0x1cb   : > { %2182 = vperm.xlu0 %3109, %v3809_v21   ;;  %2210 = vperm.xlu1 %3110, %v3781_v12   ;;  %v569_v12 = vld [vmem:[%s4916_s2 + $0xb8] sm:$0xff] }
 0x1cf   : > { %2911 = vmatmul.msk.f32.gmra.mxu3 %vm578_vm2, %v556_v9  ;;  %v3923_v54 = vpop.permute.xlu1 %852  ;;  %v3935_v9 = vpop.permute.xlu2 %854 }
 0x1d0   : > { %v3950_v62 = vpop.permute.xlu0 %850 }
 0x1d1   : > { %2214 = vperm.xlu2 %3108, %v3822_v27  }
 0x1d3   : > { %2194 = vperm.xlu0 %3109, %v3848_v35   ;;  %2222 = vperm.xlu1 %3110, %v3827_v28   ;;  %v570_v28 = vld [vmem:[%s4916_s2 + $0xc0] sm:$0xff] }
 0x1d7   : > { %2912 = vmatmul.msk.f32.gmra.mxu3 %vm578_vm2, %v557_v15  ;;  %v3947_v15 = vpop.permute.xlu1 %858  ;;  %v3953_v16 = vpop.permute.xlu2 %860 }
 0x1db   : > { %2206 = vperm.xlu0 %3109, %v3871_v42  }
 0x1df   : > { %2913 = vmatmul.msk.f32.gmra.mxu3 %vm578_vm2, %v558_v32  ;;  %v3966_v24 = vpop.permute.xlu1 %864  ;;  %v3972_v23 = vpop.permute.xlu2 %866 }
 0x1e3   : > { %2218 = vperm.xlu0 %3109, %v3893_v45  }
 0x1e7   : > { %2914 = vmatmul.msk.f32.gmra.mxu3 %vm578_vm2, %v559_v39  ;;  %v3986_v6 = vpop.permute.xlu1 %870  ;;  %v4000_v3 = vpop.permute.xlu2 %872 }
 0x1ef   : > { %2915 = vmatmul.msk.f32.gmra.mxu3 %vm578_vm2, %v560_v50 }
 0x1f7   : > { %2916 = vmatmul.msk.f32.gmra.mxu3 %vm578_vm2, %v561_v20 }
 0x1ff   : > { %2917 = vmatmul.msk.f32.gmra.mxu3 %vm578_vm2, %v562_v49 }
 0x202   : > { %v692_v5 = vpop.f32.mrf.mxu3 }
 0x203   : > { %v917_v1 = vsel %vm916_vm4, %v692_v5, %v3840_v33 }
 0x204   : > { %954 = vst.msk [vmem:[#allocation2 + $0x10] sm:$0xff] %vm949_vm3, %v917_v1 }
 0x207   : > { %2918 = vmatmul.msk.f32.gmra.mxu3 %vm578_vm2, %v563_v51  ;;  %v572_v51 = vld [vmem:[%s4916_s2 + $0xd0] sm:$0xff] }
 0x20a   : > { %v695_v58 = vpop.f32.mrf.mxu3 }
 0x20b   : > { %v918_v13 = vsel %vm916_vm4, %v695_v58, %v823_v41  ;;  %v988_v55 = vld [vmem:[#allocation2 + $0x10] sm:$0xff] }
 0x20c   : > { %955 = vst.msk [vmem:[#allocation2 + $0x18] sm:$0xff] %vm949_vm3, %v918_v13  ;;  %2939 = vmatmul.msk.f32.vlgmr.msrb.gmra.mxu2 %vm949_vm3, %v988_v55  ;;  %2974 = vmatmul.msk.f32.gmra.mxu0 %vm949_vm3, %v988_v55 }
 0x20f   : > { %2919 = vmatmul.msk.f32.gmra.mxu3 %vm578_vm2, %v564_v56 }
 0x212   : > { %v698_v59 = vpop.f32.mrf.mxu3 }
 0x213   : > { %v919_v18 = vsel %vm916_vm4, %v698_v59, %v3787_v14  ;;  %v989_v19 = vld [vmem:[#allocation2 + $0x18] sm:$0xff]  ;;  %v3969_v14 = vpop.permute.xlu0 %856 }
 0x214   : > { %956 = vst.msk [vmem:[#allocation2 + $0x20] sm:$0xff] %vm949_vm3, %v919_v18  ;;  %2940 = vmatmul.msk.f32.gmra.mxu2 %vm949_vm3, %v989_v19  ;;  %2975 = vmatmul.msk.f32.gmra.mxu0 %vm949_vm3, %v989_v19  ;;  %v573_v59 = vld [vmem:[%s4916_s2 + $0xd8] sm:$0xff] }
 0x217   : > { %2920 = vmatmul.msk.f32.gmra.mxu3 %vm578_vm2, %v565_v60 }
 0x21a   : > { %v701_v63 = vpop.f32.mrf.mxu3 }
 0x21b   : > { %v920_v25 = vsel %vm916_vm4, %v701_v63, %v3834_v30  ;;  %v990_v29 = vld [vmem:[#allocation2 + $0x20] sm:$0xff]  ;;  %v3989_v30 = vpop.permute.xlu0 %862 }
 0x21c   : > { %957 = vst.msk [vmem:[#allocation2 + $0x28] sm:$0xff] %vm949_vm3, %v920_v25  ;;  %2941 = vmatmul.msk.f32.gmra.mxu2 %vm949_vm3, %v990_v29  ;;  %2976 = vmatmul.msk.f32.gmra.mxu0 %vm949_vm3, %v990_v29  ;;  %v574_v25 = vld [vmem:[%s4916_s2 + $0xe0] sm:$0xff] }
 0x21d   : > { %3010 = vmatmul.msk.f32.vlgmr.msrb.gmra.mxu1 %vm949_vm3, %v990_v29 }
 0x21f   : > { %2921 = vmatmul.msk.f32.gmra.mxu3 %vm578_vm2, %v566_v22 }
 0x222   : > { %v704_v0 = vpop.f32.mrf.mxu3 }
 0x223   : > { %v921_v31 = vsel %vm916_vm4, %v704_v0, %v3795_v17  ;;  %v991_v32 = vld [vmem:[#allocation2 + $0x28] sm:$0xff]  ;;  %v4006_v17 = vpop.permute.xlu1 %876  ;;  %v4017_v21 = vpop.permute.xlu0 %868 }
 0x224   : > { %958 = vst.msk [vmem:[#allocation2 + $0x30] sm:$0xff] %vm949_vm3, %v921_v31  ;;  %2942 = vmatmul.msk.f32.gmra.mxu2 %vm949_vm3, %v991_v32  ;;  %2977 = vmatmul.msk.f32.gmra.mxu0 %vm949_vm3, %v991_v32 }
 0x225   : > { %3011 = vmatmul.msk.f32.gmra.mxu1 %vm949_vm3, %v991_v32 }
 0x227   : > { %2922 = vmatmul.msk.f32.gmra.mxu3 %vm578_vm2, %v567_v2  ;;  %v575_v2 = vld [vmem:[%s4916_s2 + $0xe8] sm:$0xff] }
 0x22a   : > { %v707_v10 = vpop.f32.mrf.mxu3 }
 0x22b   : > { %v922_v33 = vsel %vm916_vm4, %v707_v10, %v3842_v34  ;;  %v992_v36 = vld [vmem:[#allocation2 + $0x30] sm:$0xff]  ;;  %v4021_v34 = vpop.permute.xlu2 %878  ;;  %v4034_v39 = vpop.permute.xlu1 %882 }
 0x22c   : > { %959 = vst.msk [vmem:[#allocation2 + $0x38] sm:$0xff] %vm949_vm3, %v922_v33  ;;  %2943 = vmatmul.msk.f32.gmra.mxu2 %vm949_vm3, %v992_v36  ;;  %2978 = vmatmul.msk.f32.gmra.mxu0 %vm949_vm3, %v992_v36  ;;  %v4038_v35 = vpop.permute.xlu0 %874 }
 0x22d   : > { %3012 = vmatmul.msk.f32.gmra.mxu1 %vm949_vm3, %v992_v36 }
 0x22f   : > { %2923 = vmatmul.msk.f32.gmra.mxu3 %vm578_vm2, %v568_v7 }
 0x232   : > { %v710_v11 = vpop.f32.mrf.mxu3 }
 0x233   : > { %v923_v37 = vsel %vm916_vm4, %v710_v11, %v3896_v61  ;;  %v993_v38 = vld [vmem:[#allocation2 + $0x38] sm:$0xff]  ;;  %v4041_v27 = vpop.permute.xlu2 %1810  ;;  %v4053_v50 = vpop.permute.xlu1 %1820 }
 0x234   : > { %960 = vst.msk [vmem:[#allocation2 + $0x40] sm:$0xff] %vm949_vm3, %v923_v37  ;;  %2944 = vmatmul.msk.f32.gmra.mxu2 %vm949_vm3, %v993_v38  ;;  %2979 = vmatmul.msk.f32.gmra.mxu0 %vm949_vm3, %v993_v38  ;;  %v4056_v42 = vpop.permute.xlu0 %880  ;;  %v576_v37 = vld [vmem:[%s4916_s2 + $0xf0] sm:$0xff] }
 0x235   : > { %3013 = vmatmul.msk.f32.gmra.mxu1 %vm949_vm3, %v993_v38 }
 0x237   : > { %2924 = vmatmul.msk.f32.gmra.mxu3 %vm578_vm2, %v569_v12 }
 0x23a   : > { %v713_v40 = vpop.f32.mrf.mxu3 }
 0x23b   : > { %v924_v41 = vsel %vm916_vm4, %v713_v40, %v3865_v43  ;;  %v994_v47 = vld [vmem:[#allocation2 + $0x40] sm:$0xff]  ;;  %v4059_v53 = vpop.permute.xlu2 %1825  ;;  %v4071_v45 = vpop.permute.xlu1 %1830 }
 0x23c   : > { %961 = vst.msk [vmem:[#allocation2 + $0x48] sm:$0xff] %vm949_vm3, %v924_v41  ;;  %2945 = vmatmul.msk.f32.gmra.mxu2 %vm949_vm3, %v994_v47  ;;  %2980 = vmatmul.msk.f32.gmra.mxu0 %vm949_vm3, %v994_v47  ;;  %v4073_v5 = vpop.permute.xlu0 %1815 }
 0x23d   : > { %3014 = vmatmul.msk.f32.gmra.mxu1 %vm949_vm3, %v994_v47  ;;  %v577_v47 = vld [vmem:[%s4916_s2 + $0xf8] sm:$0xff] }
 0x23f   : > { %2925 = vmatmul.msk.f32.gmra.mxu3 %vm578_vm2, %v570_v28 }
 0x242   : > { %v716_v43 = vpop.f32.mrf.mxu3 }
 0x243   : > { %v925_v61 = vsel %vm916_vm4, %v716_v43, %v3874_v44  ;;  %v995_v20 = vld [vmem:[#allocation2 + $0x48] sm:$0xff]  ;;  %v4083_v58 = vpop.permute.xlu2 %1835  ;;  %v4087_v55 = vpop.permute.xlu1 %1845 }
 0x244   : > { %962 = vst.msk [vmem:[#allocation2 + $0x50] sm:$0xff] %vm949_vm3, %v925_v61  ;;  %2946 = vmatmul.msk.f32.gmra.mxu2 %vm949_vm3, %v995_v20  ;;  %2981 = vmatmul.msk.f32.gmra.mxu0 %vm949_vm3, %v995_v20  ;;  %v4097_v18 = vpop.permute.xlu0 %1840  ;;  %v1269_v43 = vpop.f32.mrf.mxu0 }
 0x245   : > { %3015 = vmatmul.msk.f32.gmra.mxu1 %vm949_vm3, %v995_v20 }
 0x247   : > { %2926 = vmatmul.msk.f32.gmra.mxu3 %vm578_vm2, %v571_v26 }
 0x24a   : > { %v719_v49 = vpop.f32.mrf.mxu3 }
 0x24b   : > { %v926_v44 = vsel %vm916_vm4, %v719_v49, %v3912_v48  ;;  %v996_v1 = vld [vmem:[#allocation2 + $0x50] sm:$0xff]  ;;  %v4100_v19 = vpop.permute.xlu2 %1850  ;;  %v4111_v29 = vpop.permute.xlu1 %1860 }
 0x24c   : > { %963 = vst.msk [vmem:[#allocation2 + $0x58] sm:$0xff] %vm949_vm3, %v926_v44  ;;  %2947 = vmatmul.msk.f32.gmra.mxu2 %vm949_vm3, %v996_v1  ;;  %2982 = vmatmul.msk.f32.gmra.mxu0 %vm949_vm3, %v996_v1  ;;  %v4114_v22 = vpop.permute.xlu0 %1855 }
 0x24d   : > { %3016 = vmatmul.msk.f32.gmra.mxu1 %vm949_vm3, %v996_v1  ;;  %v1272_v1 = vpop.f32.mrf.mxu0 }
 0x24f   : > { %2927 = vmatmul.msk.f32.gmra.mxu3 %vm578_vm2, %v572_v51  ;;  %v3111_v51 = vld [vmem:[%s4921_s7] ss:$0 sm:$0xff] }
 0x250   : > { %2580 = vrot.lane.b32.xlu0 %v3111_v51, %s3180_s29 }
 0x252   : > { %v722_v13 = vpop.f32.mrf.mxu3 }
 0x253   : > { %v927_v48 = vsel %vm916_vm4, %v722_v13, %v3887_v57  ;;  %v997_v56 = vld [vmem:[#allocation2 + $0x58] sm:$0xff]  ;;  %v4128_v10 = vpop.permute.xlu1 %1875 }
 0x254   : > { %964 = vst.msk [vmem:[#allocation2 + $0x60] sm:$0xff] %vm949_vm3, %v927_v48  ;;  %2948 = vmatmul.msk.f32.gmra.mxu2 %vm949_vm3, %v997_v56  ;;  %2983 = vmatmul.msk.f32.gmra.mxu0 %vm949_vm3, %v997_v56  ;;  %v4131_v33 = vpop.permute.xlu0 %1870 }
 0x255   : > { %3017 = vmatmul.msk.f32.gmra.mxu1 %vm949_vm3, %v997_v56 }
 0x257   : > { %2928 = vmatmul.msk.f32.gmra.mxu3 %vm578_vm2, %v573_v59 }
 0x25a   : > { %v725_v57 = vpop.f32.mrf.mxu3 }
 0x25b   : > { %v928_v60 = vsel %vm916_vm4, %v725_v57, %v3898_v46  ;;  %v998_v63 = vld [vmem:[#allocation2 + $0x60] sm:$0xff]  ;;  %v4117_v46 = vpop.permute.xlu2 %1865  ;;  %v4145_v38 = vpop.permute.xlu1 %1890 }
 0x25c   : > { %965 = vst.msk [vmem:[#allocation2 + $0x68] sm:$0xff] %vm949_vm3, %v928_v60  ;;  %2949 = vmatmul.msk.f32.gmra.mxu2 %vm949_vm3, %v998_v63  ;;  %2984 = vmatmul.msk.f32.gmra.mxu0 %vm949_vm3, %v998_v63  ;;  %v4147_v40 = vpop.permute.xlu0 %1885 }
 0x25d   : > { %3018 = vmatmul.msk.f32.gmra.mxu1 %vm949_vm3, %v998_v63 }
 0x25f   : > { %2929 = vmatmul.msk.f32.gmra.mxu3 %vm578_vm2, %v574_v25 }
 0x262   : > { %v728_v0 = vpop.f32.mrf.mxu3 }
 0x263   : > { %v929_v31 = vsel %vm916_vm4, %v728_v0, %v3933_v52  ;;  %v999_v32 = vld [vmem:[#allocation2 + $0x68] sm:$0xff]  ;;  %v4133_v36 = vpop.permute.xlu2 %1880 }
 0x264   : > { %966 = vst.msk [vmem:[#allocation2 + $0x70] sm:$0xff] %vm949_vm3, %v929_v31  ;;  %2950 = vmatmul.msk.f32.gmra.mxu2 %vm949_vm3, %v999_v32  ;;  %2985 = vmatmul.msk.f32.gmra.mxu0 %vm949_vm3, %v999_v32  ;;  %v4168_v49 = vpop.permute.xlu0 %1900 }
 0x265   : > { %3019 = vmatmul.msk.f32.gmra.mxu1 %vm949_vm3, %v999_v32 }
 0x267   : > { %2930 = vmatmul.msk.f32.gmra.mxu3 %vm578_vm2, %v575_v2 }
 0x26a   : > { %v731_v52 = vpop.f32.mrf.mxu3 }
 0x26b   : > { %v930_v7 = vsel %vm916_vm4, %v731_v52, %v3909_v4  ;;  %v1000_v11 = vld [vmem:[#allocation2 + $0x70] sm:$0xff]  ;;  %v4157_v28 = vpop.permute.xlu2 %1895 }
 0x26c   : > { %967 = vst.msk [vmem:[#allocation2 + $0x78] sm:$0xff] %vm949_vm3, %v930_v7  ;;  %2951 = vmatmul.msk.f32.gmra.mxu2 %vm949_vm3, %v1000_v11  ;;  %2986 = vmatmul.msk.f32.gmra.mxu0 %vm949_vm3, %v1000_v11  ;;  %v4185_v59 = vpop.permute.xlu0 %1915 }
 0x26d   : > { %3020 = vmatmul.msk.f32.gmra.mxu1 %vm949_vm3, %v1000_v11 }
 0x26f   : > { %2931 = vmatmul.msk.f32.gmra.mxu3 %vm578_vm2, %v576_v37 }
 0x272   : > { %v734_v12 = vpop.f32.mrf.mxu3 }
 0x273   : > { %v931_v4 = vsel %vm916_vm4, %v734_v12, %v3919_v8  ;;  %v1001_v41 = vld [vmem:[#allocation2 + $0x78] sm:$0xff]  ;;  %v4161_v8 = vpop.permute.xlu1 %1905  ;;  %v4171_v44 = vpop.permute.xlu2 %1910 }
 0x274   : > { %968 = vst.msk [vmem:[#allocation2 + $0x80] sm:$0xff] %vm949_vm3, %v931_v4  ;;  %2952 = vmatmul.msk.f32.gmra.mxu2 %vm949_vm3, %v1001_v41  ;;  %2987 = vmatmul.msk.f32.gmra.mxu0 %vm949_vm3, %v1001_v41  ;;  %v4199_v32 = vpop.permute.xlu0 %1930 }
 0x275   : > { %3021 = vmatmul.msk.f32.gmra.mxu1 %vm949_vm3, %v1001_v41 }
 0x277   : > { %2932 = vmatmul.msk.f32.gmra.mxu3 %vm578_vm2, %v577_v47 }
 0x27a   : > { %v737_v61 = vpop.f32.mrf.mxu3 }
 0x27b   : > { %v932_v20 = vsel %vm916_vm4, %v737_v61, %v3950_v62  ;;  %v1002_v26 = vld [vmem:[#allocation2 + $0x80] sm:$0xff]  ;;  %v4182_v56 = vpop.permute.xlu1 %1920  ;;  %v4187_v57 = vpop.permute.xlu2 %1925 }
 0x27c   : > { %969 = vst.msk [vmem:[#allocation2 + $0x88] sm:$0xff] %vm949_vm3, %v932_v20  ;;  %2953 = vmatmul.msk.f32.gmra.mxu2 %vm949_vm3, %v1002_v26  ;;  %2988 = vmatmul.msk.f32.gmra.mxu0 %vm949_vm3, %v1002_v26  ;;  %v4215_v20 = vpop.permute.xlu0 %1945 }
 0x27d   : > { %3022 = vmatmul.msk.f32.gmra.mxu1 %vm949_vm3, %v1002_v26 }
 0x282   : > { %v740_v13 = vpop.f32.mrf.mxu3 }
 0x283   : > { %v933_v62 = vsel %vm916_vm4, %v740_v13, %v3923_v54  ;;  %v1003_v48 = vld [vmem:[#allocation2 + $0x88] sm:$0xff]  ;;  %v4197_v0 = vpop.permute.xlu1 %1935  ;;  %v4203_v7 = vpop.permute.xlu2 %1940 }
 0x284   : > { %970 = vst.msk [vmem:[#allocation2 + $0x90] sm:$0xff] %vm949_vm3, %v933_v62  ;;  %2954 = vmatmul.msk.f32.gmra.mxu2 %vm949_vm3, %v1003_v48  ;;  %2989 = vmatmul.msk.f32.gmra.mxu0 %vm949_vm3, %v1003_v48 }
 0x285   : > { %3023 = vmatmul.msk.f32.gmra.mxu1 %vm949_vm3, %v1003_v48 }
 0x289   : > { %v4189_v60 = vpop.f32.mrf.mxu0 }
 0x28a   : > { %v743_v63 = vpop.f32.mrf.mxu3 }
 0x28b   : > { %v934_v54 = vsel %vm916_vm4, %v743_v63, %v3935_v9  ;;  %v1004_v25 = vld [vmem:[#allocation2 + $0x90] sm:$0xff]  ;;  %v4211_v12 = vpop.permute.xlu1 %1950 }
 0x28c   : > { %971 = vst.msk [vmem:[#allocation2 + $0x98] sm:$0xff] %vm949_vm3, %v934_v54  ;;  %2955 = vmatmul.msk.f32.gmra.mxu2 %vm949_vm3, %v1004_v25  ;;  %2990 = vmatmul.msk.f32.gmra.mxu0 %vm949_vm3, %v1004_v25 }
 0x28d   : > { %3024 = vmatmul.msk.f32.gmra.mxu1 %vm949_vm3, %v1004_v25  ;;  %4928 = vst [vmem:[#allocation6_spill] sm:$0xff] %v4211_v12 }
 0x28f   : > { %v1147_v31 = vpop.f32.mrf.mxu2 }
 0x290   : > { %v1270_v4 = vadd.f32 %v1269_v43, %v1147_v31  ;;  %v4224_v43 = vpop.permute.xlu2 %1955 }
 0x291   : > { %v4201_v2 = vpop.f32.mrf.mxu0  ;;  %4929 = vst [vmem:[#allocation7_spill] sm:$0xff] %v4224_v43 }
 0x292   : > { %v746_v52 = vpop.f32.mrf.mxu3 }
 0x293   : > { %v935_v9 = vsel %vm916_vm4, %v746_v52, %v3969_v14  ;;  %v1005_v11 = vld [vmem:[#allocation2 + $0x98] sm:$0xff]  ;;  %v4233_v52 = vpop.permute.xlu1 %1965 }
 0x294   : > { %972 = vst.msk [vmem:[#allocation2 + $0xa0] sm:$0xff] %vm949_vm3, %v935_v9  ;;  %2956 = vmatmul.msk.f32.gmra.mxu2 %vm949_vm3, %v1005_v11  ;;  %2991 = vmatmul.msk.f32.gmra.mxu0 %vm949_vm3, %v1005_v11 }
 0x295   : > { %3025 = vmatmul.msk.f32.gmra.mxu1 %vm949_vm3, %v1005_v11  ;;  %4930 = vst [vmem:[#allocation8_spill] sm:$0xff] %v4233_v52 }
 0x297   : > { %v1150_v37 = vpop.f32.mrf.mxu2 }
 0x299   : > { %v4213_v41 = vpop.f32.mrf.mxu0 }
 0x29a   : > { %v1519_v47 = vpop.f32.mrf.mxu1  ;;  %v749_v61 = vpop.f32.mrf.mxu3 }
 0x29b   : > { %v4217_v14 = vadd.f32 %v1519_v47, %v1270_v4  ;;  %v936_v26 = vsel %vm916_vm4, %v749_v61, %v3947_v15  ;;  %v1006_v51 = vld [vmem:[#allocation2 + $0xa0] sm:$0xff]  ;;  %v1273_v15 = vadd.f32 %v1272_v1, %v1150_v37  ;;  %v2099_v61 = vpop.permute.xlu2 %2098 }
 0x29c   : > { %973 = vst.msk [vmem:[#allocation2 + $0xa8] sm:$0xff] %vm949_vm3, %v936_v26  ;;  %2957 = vmatmul.msk.f32.gmra.mxu2 %vm949_vm3, %v1006_v51  ;;  %2992 = vmatmul.msk.f32.gmra.mxu0 %vm949_vm3, %v1006_v51 }
 0x29d   : > { %v1680_v13 = vrot.slane %v4217_v14, 7  ;;  %3026 = vmatmul.msk.f32.gmra.mxu1 %vm949_vm3, %v1006_v51  ;;  %v2001_v1 = vrot.slane %v4217_v14, 1 }
 0x29f   : > { %v1153_v62 = vpop.f32.mrf.mxu2  ;;  %v1775_v48 = vsel %vm1679_vm5, 0.0, %v1680_v13 }
 0x2a0   : > { %v1968_v63 = vmul.f32 %v4041_v27, %v1775_v48  ;;  %v4242_v27 = vpop.permute.xlu0 %1960 }
 0x2a1   : > { %v4230_v54 = vpop.f32.mrf.mxu0  ;;  %4931 = vst [vmem:[#allocation9_spill] sm:$0xff] %v4242_v27 }
 0x2a2   : > { %2289 = vrot.lane.b32.xlu2 %v1968_v63, %s3180_s29  ;;  %v1522_v25 = vpop.f32.mrf.mxu1  ;;  %v752_v31 = vpop.f32.mrf.mxu3 }
 0x2a3   : > { %v4235_v9 = vadd.f32 %v1522_v25, %v1273_v15  ;;  %v937_v11 = vsel %vm916_vm4, %v752_v31, %v3953_v16  ;;  %v1007_v4 = vld [vmem:[#allocation2 + $0xa8] sm:$0xff]  ;;  %v1276_v15 = vadd.f32 %v4189_v60, %v1153_v62 }
 0x2a4   : > { %974 = vst.msk [vmem:[#allocation2 + $0xb0] sm:$0xff] %vm949_vm3, %v937_v11  ;;  %2958 = vmatmul.msk.f32.gmra.mxu2 %vm949_vm3, %v1007_v4  ;;  %2993 = vmatmul.msk.f32.gmra.mxu0 %vm949_vm3, %v1007_v4 }
 0x2a5   : > { %v1681_v37 = vrot.slane %v4235_v9, 7  ;;  %v2002_v47 = vrot.slane %v4235_v9, 1  ;;  %3027 = vmatmul.msk.f32.gmra.mxu1 %vm949_vm3, %v1007_v4 }
 0x2a7   : > { %v1156_v16 = vpop.f32.mrf.mxu2  ;;  %v2003_v26 = vsel %vm2000_vm6, %v2001_v1, %v2002_v47  ;;  %v1682_v51 = vsel %vm1679_vm5, %v1680_v13, %v1681_v37 }
 0x2a8   : > { %v2225_v48 = vmul.f32 %v2099_v61, %v2003_v26  ;;  %v1969_v63 = vmul.f32 %v4073_v5, %v1682_v51  ;;  %v2107_v5 = vpop.permute.xlu1 %2106  ;;  %v2103_v61 = vpop.permute.xlu0 %2102 }
 0x2a9   : > { %v4252_v25 = vpop.f32.mrf.mxu0 }
 0x2aa   : > { %2449 = vrot.lane.b32.xlu1 %v2225_v48, %s3181_s14  ;;  %2291 = vrot.lane.b32.xlu0 %v1969_v63, %s3180_s29  ;;  %v1525_v31 = vpop.f32.mrf.mxu1  ;;  %v755_v11 = vpop.f32.mrf.mxu3 }
 0x2ab   : > { %v4256_v4 = vadd.f32 %v1525_v31, %v1276_v15  ;;  %v938_v1 = vsel %vm916_vm4, %v755_v11, %v3989_v30  ;;  %v1008_v13 = vld [vmem:[#allocation2 + $0xb0] sm:$0xff]  ;;  %v1279_v15 = vadd.f32 %v4201_v2, %v1156_v16 }
 0x2ac   : > { %975 = vst.msk [vmem:[#allocation2 + $0xb8] sm:$0xff] %vm949_vm3, %v938_v1  ;;  %2959 = vmatmul.msk.f32.gmra.mxu2 %vm949_vm3, %v1008_v13  ;;  %2994 = vmatmul.msk.f32.gmra.mxu0 %vm949_vm3, %v1008_v13 }
 0x2ad   : > { %v1683_v60 = vrot.slane %v4256_v4, 7  ;;  %v2004_v62 = vrot.slane %v4256_v4, 1  ;;  %3028 = vmatmul.msk.f32.gmra.mxu1 %vm949_vm3, %v1008_v13  ;;  %v2111_v13 = vpop.permute.xlu2 %2110 }
 0x2af   : > { %v1159_v26 = vpop.f32.mrf.mxu2  ;;  %v2005_v51 = vsel %vm2000_vm6, %v2002_v47, %v2004_v62  ;;  %v1684_v30 = vsel %vm1679_vm5, %v1681_v37, %v1683_v60 }
 0x2b0   : > { %v2226_v48 = vmul.f32 %v2103_v61, %v2005_v51  ;;  %v1970_v63 = vmul.f32 %v4053_v50, %v1684_v30  ;;  %v2115_v16 = vpop.permute.xlu1 %2114 }
 0x2b1   : > { %v4270_v31 = vpop.f32.mrf.mxu0 }
 0x2b2   : > { %2451 = vrot.lane.b32.xlu2 %v2226_v48, %s3181_s14  ;;  %2293 = vrot.lane.b32.xlu1 %v1970_v63, %s3180_s29  ;;  %v1528_v11 = vpop.f32.mrf.mxu1  ;;  %v758_v1 = vpop.f32.mrf.mxu3 }
 0x2b3   : > { %v4274_v52 = vadd.f32 %v1528_v11, %v1279_v15  ;;  %v939_v47 = vsel %vm916_vm4, %v758_v1, %v3966_v24  ;;  %v1009_v37 = vld [vmem:[#allocation2 + $0xb8] sm:$0xff]  ;;  %v4287_v63 = vpop.permute.xlu0 %2122  ;;  %v1282_v15 = vadd.f32 %v4213_v41, %v1159_v26 }
 0x2b4   : > { %976 = vst.msk [vmem:[#allocation2 + $0xc0] sm:$0xff] %vm949_vm3, %v939_v47  ;;  %2960 = vmatmul.msk.f32.gmra.mxu2 %vm949_vm3, %v1009_v37  ;;  %2995 = vmatmul.msk.f32.gmra.mxu0 %vm949_vm3, %v1009_v37 }
 0x2b5   : > { %v1685_v50 = vrot.slane %v4274_v52, 7  ;;  %v2006_v2 = vrot.slane %v4274_v52, 1  ;;  %3029 = vmatmul.msk.f32.gmra.mxu1 %vm949_vm3, %v1009_v37 }
 0x2b7   : > { %v1162_v61 = vpop.f32.mrf.mxu2  ;;  %v2007_v51 = vsel %vm2000_vm6, %v2004_v62, %v2006_v2  ;;  %v1686_v30 = vsel %vm1679_vm5, %v1683_v60, %v1685_v50 }
 0x2b8   : > { %v2227_v24 = vmul.f32 %v2107_v5, %v2007_v51  ;;  %v1971_v48 = vmul.f32 %v4059_v53, %v1686_v30  ;;  %v2119_v53 = vpop.permute.xlu2 %2118 }
 0x2b9   : > { %v4290_v11 = vpop.f32.mrf.mxu0 }
 0x2ba   : > { %2453 = vrot.lane.b32.xlu0 %v2227_v24, %s3181_s14  ;;  %2295 = vrot.lane.b32.xlu2 %v1971_v48, %s3180_s29  ;;  %v1531_v1 = vpop.f32.mrf.mxu1  ;;  %v761_v47 = vpop.f32.mrf.mxu3 }
 0x2bb   : > { %v4294_v37 = vadd.f32 %v1531_v1, %v1282_v15  ;;  %v940_v60 = vsel %vm916_vm4, %v761_v47, %v3972_v23  ;;  %v1010_v5 = vld [vmem:[#allocation2 + $0xc0] sm:$0xff]  ;;  %v4307_v48 = vpop.permute.xlu1 %2126  ;;  %v1285_v15 = vadd.f32 %v4230_v54, %v1162_v61 }
 0x2bc   : > { %977 = vst.msk [vmem:[#allocation2 + $0xc8] sm:$0xff] %vm949_vm3, %v940_v60  ;;  %2961 = vmatmul.msk.f32.gmra.mxu2 %vm949_vm3, %v1010_v5  ;;  %2996 = vmatmul.msk.f32.gmra.mxu0 %vm949_vm3, %v1010_v5 }
 0x2bd   : > { %v1687_v41 = vrot.slane %v4294_v37, 7  ;;  %v2008_v62 = vrot.slane %v4294_v37, 1  ;;  %3030 = vmatmul.msk.f32.gmra.mxu1 %vm949_vm3, %v1010_v5  ;;  %v4314_v5 = vpop.permute.xlu0 %2134 }
 0x2bf   : > { %v1165_v26 = vpop.f32.mrf.mxu2  ;;  %v2009_v51 = vsel %vm2000_vm6, %v2006_v2, %v2008_v62  ;;  %v1688_v30 = vsel %vm1679_vm5, %v1685_v50, %v1687_v41 }
 0x2c0   : > { %v2228_v23 = vmul.f32 %v2111_v13, %v2009_v51  ;;  %v1972_v24 = vmul.f32 %v4071_v45, %v1688_v30  ;;  %v4326_v61 = vpop.permute.xlu2 %2130 }
 0x2c1   : > { %v4310_v1 = vpop.f32.mrf.mxu0 }
 0x2c2   : > { %2455 = vrot.lane.b32.xlu1 %v2228_v23, %s3181_s14  ;;  %2297 = vrot.lane.b32.xlu0 %v1972_v24, %s3180_s29  ;;  %v1534_v47 = vpop.f32.mrf.mxu1  ;;  %v764_v60 = vpop.f32.mrf.mxu3 }
 0x2c3   : > { %v4316_v2 = vadd.f32 %v1534_v47, %v1285_v15  ;;  %v941_v13 = vsel %vm916_vm4, %v764_v60, %v4017_v21  ;;  %v1011_v45 = vld [vmem:[#allocation2 + $0xc8] sm:$0xff]  ;;  %v1288_v15 = vadd.f32 %v4252_v25, %v1165_v26 }
 0x2c4   : > { %978 = vst.msk [vmem:[#allocation2 + $0xd0] sm:$0xff] %vm949_vm3, %v941_v13  ;;  %2962 = vmatmul.msk.f32.gmra.mxu2 %vm949_vm3, %v1011_v45  ;;  %2997 = vmatmul.msk.f32.gmra.mxu0 %vm949_vm3, %v1011_v45 }
 0x2c5   : > { %v1689_v54 = vrot.slane %v4316_v2, 7  ;;  %v2010_v50 = vrot.slane %v4316_v2, 1  ;;  %3031 = vmatmul.msk.f32.gmra.mxu1 %vm949_vm3, %v1011_v45  ;;  %v4336_v45 = vpop.permute.xlu1 %2138 }
 0x2c7   : > { %v1168_v51 = vpop.f32.mrf.mxu2  ;;  %v2011_v30 = vsel %vm2000_vm6, %v2008_v62, %v2010_v50  ;;  %v1690_v21 = vsel %vm1679_vm5, %v1687_v41, %v1689_v54 }
 0x2c8   : > { %v2229_v23 = vmul.f32 %v2115_v16, %v2011_v30  ;;  %v1973_v24 = vmul.f32 %v4083_v58, %v1690_v21  ;;  %v4345_v58 = vpop.permute.xlu0 %2146 }
 0x2c9   : > { %v4332_v47 = vpop.f32.mrf.mxu0 }
 0x2ca   : > { %2457 = vrot.lane.b32.xlu2 %v2229_v23, %s3181_s14  ;;  %2299 = vrot.lane.b32.xlu1 %v1973_v24, %s3180_s29  ;;  %v1537_v60 = vpop.f32.mrf.mxu1  ;;  %v767_v13 = vpop.f32.mrf.mxu3 }
 0x2cb   : > { %v4338_v27 = vadd.f32 %v1537_v60, %v1288_v15  ;;  %v942_v41 = vsel %vm916_vm4, %v767_v13, %v3986_v6  ;;  %v1012_v16 = vld [vmem:[#allocation2 + $0xd0] sm:$0xff]  ;;  %v4353_v24 = vpop.permute.xlu2 %2142  ;;  %v1291_v15 = vadd.f32 %v4270_v31, %v1168_v51 }
 0x2cc   : > { %979 = vst.msk [vmem:[#allocation2 + $0xd8] sm:$0xff] %vm949_vm3, %v942_v41  ;;  %2963 = vmatmul.msk.f32.gmra.mxu2 %vm949_vm3, %v1012_v16  ;;  %2998 = vmatmul.msk.f32.gmra.mxu0 %vm949_vm3, %v1012_v16 }
 0x2cd   : > { %v1691_v25 = vrot.slane %v4338_v27, 7  ;;  %v2012_v62 = vrot.slane %v4338_v27, 1  ;;  %3032 = vmatmul.msk.f32.gmra.mxu1 %vm949_vm3, %v1012_v16 }
 0x2cf   : > { %v1171_v26 = vpop.f32.mrf.mxu2  ;;  %v2013_v30 = vsel %vm2000_vm6, %v2010_v50, %v2012_v62  ;;  %v1692_v6 = vsel %vm1679_vm5, %v1689_v54, %v1691_v25 }
 0x2d0   : > { %v2230_v21 = vmul.f32 %v2119_v53, %v2013_v30  ;;  %v1974_v23 = vmul.f32 %v4097_v18, %v1692_v6  ;;  %v4367_v18 = vpop.permute.xlu1 %2150  ;;  %v4372_v51 = vpop.permute.xlu0 %2158 }
 0x2d1   : > { %v4356_v60 = vpop.f32.mrf.mxu0 }
 0x2d2   : > { %2459 = vrot.lane.b32.xlu0 %v2230_v21, %s3181_s14  ;;  %2301 = vrot.lane.b32.xlu2 %v1974_v23, %s3180_s29  ;;  %v1540_v13 = vpop.f32.mrf.mxu1  ;;  %v770_v41 = vpop.f32.mrf.mxu3 }
 0x2d3   : > { %v4360_v16 = vadd.f32 %v1540_v13, %v1291_v15  ;;  %v943_v54 = vsel %vm916_vm4, %v770_v41, %v4000_v3  ;;  %v1013_v53 = vld [vmem:[#allocation2 + $0xd8] sm:$0xff]  ;;  %v1294_v15 = vadd.f32 %v4290_v11, %v1171_v26 }
 0x2d4   : > { %980 = vst.msk [vmem:[#allocation2 + $0xe0] sm:$0xff] %vm949_vm3, %v943_v54  ;;  %2964 = vmatmul.msk.f32.gmra.mxu2 %vm949_vm3, %v1013_v53  ;;  %2999 = vmatmul.msk.f32.gmra.mxu0 %vm949_vm3, %v1013_v53 }
 0x2d5   : > { %v1693_v31 = vrot.slane %v4360_v16, 7  ;;  %v2014_v50 = vrot.slane %v4360_v16, 1  ;;  %3033 = vmatmul.msk.f32.gmra.mxu1 %vm949_vm3, %v1013_v53  ;;  %v4383_v53 = vpop.permute.xlu2 %2154 }
 0x2d7   : > { %v1174_v30 = vpop.f32.mrf.mxu2  ;;  %v2015_v3 = vsel %vm2000_vm6, %v2012_v62, %v2014_v50  ;;  %v1694_v6 = vsel %vm1679_vm5, %v1691_v25, %v1693_v31 }
 0x2d8   : > { %v2231_v21 = vmul.f32 %v4287_v63, %v2015_v3  ;;  %v1975_v23 = vmul.f32 %v4087_v55, %v1694_v6  ;;  %v4395_v62 = vpop.permute.xlu1 %2162 }
 0x2d9   : > { %v4379_v13 = vpop.f32.mrf.mxu0 }
 0x2da   : > { %2461 = vrot.lane.b32.xlu1 %v2231_v21, %s3181_s14  ;;  %2303 = vrot.lane.b32.xlu0 %v1975_v23, %s3180_s29  ;;  %v1543_v41 = vpop.f32.mrf.mxu1  ;;  %v773_v54 = vpop.f32.mrf.mxu3 }
 0x2db   : > { %v4385_v43 = vadd.f32 %v1543_v41, %v1294_v15  ;;  %v944_v25 = vsel %vm916_vm4, %v773_v54, %v4038_v35  ;;  %v1014_v63 = vld [vmem:[#allocation2 + $0xe0] sm:$0xff]  ;;  %v4401_v23 = vpop.permute.xlu0 %2170  ;;  %v1297_v15 = vadd.f32 %v4310_v1, %v1174_v30 }
 0x2dc   : > { %981 = vst.msk [vmem:[#allocation2 + $0xe8] sm:$0xff] %vm949_vm3, %v944_v25  ;;  %2965 = vmatmul.msk.f32.gmra.mxu2 %vm949_vm3, %v1014_v63  ;;  %3000 = vmatmul.msk.f32.gmra.mxu0 %vm949_vm3, %v1014_v63 }
 0x2dd   : > { %v1695_v55 = vrot.slane %v4385_v43, 7  ;;  %v2016_v11 = vrot.slane %v4385_v43, 1  ;;  %3034 = vmatmul.msk.f32.gmra.mxu1 %vm949_vm3, %v1014_v63 }
 0x2df   : > { %v1177_v26 = vpop.f32.mrf.mxu2  ;;  %v2017_v3 = vsel %vm2000_vm6, %v2014_v50, %v2016_v11  ;;  %v1696_v35 = vsel %vm1679_vm5, %v1693_v31, %v1695_v55 }
 0x2e0   : > { %v2232_v6 = vmul.f32 %v4307_v48, %v2017_v3  ;;  %v1976_v21 = vmul.f32 %v4100_v19, %v1696_v35  ;;  %v4415_v19 = vpop.permute.xlu2 %2166 }
 0x2e1   : > { %v4404_v41 = vpop.f32.mrf.mxu0 }
 0x2e2   : > { %2463 = vrot.lane.b32.xlu2 %v2232_v6, %s3181_s14  ;;  %2305 = vrot.lane.b32.xlu1 %v1976_v21, %s3180_s29  ;;  %v1546_v54 = vpop.f32.mrf.mxu1  ;;  %v776_v25 = vpop.f32.mrf.mxu3 }
 0x2e3   : > { %v4408_v63 = vadd.f32 %v1546_v54, %v1297_v15  ;;  %v945_v31 = vsel %vm916_vm4, %v776_v25, %v4006_v17  ;;  %v1015_v48 = vld [vmem:[#allocation2 + $0xe8] sm:$0xff]  ;;  %v4424_v21 = vpop.permute.xlu1 %2174  ;;  %v1300_v15 = vadd.f32 %v4332_v47, %v1177_v26 }
 0x2e4   : > { %982 = vst.msk [vmem:[#allocation2 + $0xf0] sm:$0xff] %vm949_vm3, %v945_v31  ;;  %2966 = vmatmul.msk.f32.gmra.mxu2 %vm949_vm3, %v1015_v48  ;;  %3001 = vmatmul.msk.f32.vlgmr.msrb.gmra.mxu3 %vm949_vm3, %v1015_v48  ;;  %v4429_v31 = vpop.permute.xlu0 %2182 }
 0x2e5   : > { %v1697_v1 = vrot.slane %v4408_v63, 7  ;;  %v2018_v50 = vrot.slane %v4408_v63, 1  ;;  %3035 = vmatmul.msk.f32.gmra.mxu1 %vm949_vm3, %v1015_v48 }
 0x2e7   : > { %v1180_v30 = vpop.f32.mrf.mxu2  ;;  %v2019_v3 = vsel %vm2000_vm6, %v2016_v11, %v2018_v50  ;;  %v1698_v17 = vsel %vm1679_vm5, %v1695_v55, %v1697_v1 }
 0x2e8   : > { %v2233_v35 = vmul.f32 %v4326_v61, %v2019_v3  ;;  %v1977_v6 = vmul.f32 %v4114_v22, %v1698_v17  ;;  %v4443_v26 = vpop.permute.xlu2 %2178 }
 0x2e9   : > { %v4435_v11 = vpop.f32.mrf.mxu0 }
 0x2ea   : > { %2465 = vrot.lane.b32.xlu0 %v2233_v35, %s3181_s14  ;;  %2307 = vrot.lane.b32.xlu2 %v1977_v6, %s3180_s29  ;;  %v1549_v54 = vpop.f32.mrf.mxu1  ;;  %v779_v25 = vpop.f32.mrf.mxu3 }
 0x2eb   : > { %v4431_v48 = vadd.f32 %v1549_v54, %v1300_v15  ;;  %v946_v55 = vsel %vm916_vm4, %v779_v25, %v4021_v34  ;;  %v1016_v61 = vld [vmem:[#allocation2 + $0xf0] sm:$0xff]  ;;  %v1303_v15 = vadd.f32 %v4356_v60, %v1180_v30  ;;  %v4456_v12 = vpop.permute.xlu1 %2186 }
 0x2ec   : > { %983 = vst.msk [vmem:[#allocation2 + $0xf8] sm:$0xff] %vm949_vm3, %v946_v55  ;;  %2967 = vmatmul.msk.f32.gmra.mxu2 %vm949_vm3, %v1016_v61  ;;  %3002 = vmatmul.msk.f32.gmra.mxu3 %vm949_vm3, %v1016_v61 }
 0x2ed   : > { %v1699_v22 = vrot.slane %v4431_v48, 7  ;;  %v2020_v47 = vrot.slane %v4431_v48, 1  ;;  %3036 = vmatmul.msk.f32.gmra.mxu1 %vm949_vm3, %v1016_v61 }
 0x2ef   : > { %v1183_v3 = vpop.f32.mrf.mxu2  ;;  %v2021_v34 = vsel %vm2000_vm6, %v2018_v50, %v2020_v47  ;;  %v1700_v17 = vsel %vm1679_vm5, %v1697_v1, %v1699_v22 }
 0x2f0   : > { %v2234_v35 = vmul.f32 %v4314_v5, %v2021_v34  ;;  %v1978_v6 = vmul.f32 %v4111_v29, %v1700_v17  ;;  %v4461_v29 = vpop.permute.xlu0 %2194 }
 0x2f1   : > { %v1314_v1 = vpop.f32.mrf.mxu0 }
 0x2f2   : > { %2467 = vrot.lane.b32.xlu1 %v2234_v35, %s3181_s14  ;;  %2309 = vrot.lane.b32.xlu0 %v1978_v6, %s3180_s29  ;;  %v1552_v54 = vpop.f32.mrf.mxu1  ;;  %v782_v25 = vpop.f32.mrf.mxu3 }
 0x2f3   : > { %v4452_v55 = vadd.f32 %v1552_v54, %v1303_v15  ;;  %v947_v61 = vsel %vm916_vm4, %v782_v25, %v4056_v42  ;;  %v1017_v50 = vld [vmem:[#allocation2 + $0xf8] sm:$0xff]  ;;  %v4470_v6 = vpop.permute.xlu2 %2190  ;;  %v1306_v15 = vadd.f32 %v4379_v13, %v1183_v3  ;;  %v4484_v13 = vpop.permute.xlu1 %2198 }
 0x2f4   : > { %984 = vst.msk [vmem:[#allocation2 + $0x100] sm:$0xff] %vm949_vm3, %v947_v61  ;;  %2968 = vmatmul.msk.f32.gmra.mxu2 %vm949_vm3, %v1017_v50  ;;  %3003 = vmatmul.msk.f32.gmra.mxu3 %vm949_vm3, %v1017_v50 }
 0x2f5   : > { %v1701_v5 = vrot.slane %v4452_v55, 7  ;;  %v2022_v60 = vrot.slane %v4452_v55, 1  ;;  %3037 = vmatmul.msk.f32.gmra.mxu1 %vm949_vm3, %v1017_v50 }
 0x2f7   : > { %v1186_v30 = vpop.f32.mrf.mxu2  ;;  %v2023_v42 = vsel %vm2000_vm6, %v2020_v47, %v2022_v60  ;;  %v1702_v34 = vsel %vm1679_vm5, %v1699_v22, %v1701_v5 }
 0x2f8   : > { %v2235_v17 = vmul.f32 %v4336_v45, %v2023_v42  ;;  %v1979_v35 = vmul.f32 %v4117_v46, %v1702_v34  ;;  %v4486_v3 = vpop.permute.xlu0 %2206 }
 0x2f9   : > { %v1317_v34 = vpop.f32.mrf.mxu0 }
 0x2fa   : > { %2469 = vrot.lane.b32.xlu2 %v2235_v17, %s3181_s14  ;;  %2311 = vrot.lane.b32.xlu1 %v1979_v35, %s3180_s29  ;;  %v1555_v54 = vpop.f32.mrf.mxu1  ;;  %v785_v25 = vpop.f32.mrf.mxu3 }
 0x2fb   : > { %v4475_v61 = vadd.f32 %v1555_v54, %v1306_v15  ;;  %v948_v47 = vsel %vm916_vm4, %v785_v25, %v4034_v39  ;;  %v1023_v22 = vld [vmem:[#allocation2 + $0x100] sm:$0xff]  ;;  %v1309_v15 = vadd.f32 %v4404_v41, %v1186_v30 }
 0x2fc   : > { %985 = vst.msk [vmem:[#allocation2 + $0x108] sm:$0xff] %vm949_vm3, %v948_v47  ;;  %2969 = vmatmul.msk.f32.gmra.mxu2 %vm949_vm3, %v1023_v22 }
 0x2fd   : > { %v1703_v46 = vrot.slane %v4475_v61, 7  ;;  %v2024_v45 = vrot.slane %v4475_v61, 1  ;;  %3038 = vmatmul.msk.f32.gmra.mxu1 %vm949_vm3, %v1023_v22  ;;  %v4497_v22 = vpop.permute.xlu2 %2202 }
 0x2ff   : > { %v1189_v50 = vpop.f32.mrf.mxu2  ;;  %v2025_v42 = vsel %vm2000_vm6, %v2022_v60, %v2024_v45  ;;  %v1704_v39 = vsel %vm1679_vm5, %v1701_v5, %v1703_v46 }
 0x300   : > { %v2236_v17 = vmul.f32 %v4353_v24, %v2025_v42  ;;  %v1980_v35 = vmul.f32 %v4131_v33, %v1704_v39  ;;  %v4507_v39 = vpop.permute.xlu1 %2210 }
 0x302   : > { %2471 = vrot.lane.b32.xlu0 %v2236_v17, %s3181_s14  ;;  %2313 = vrot.lane.b32.xlu2 %v1980_v35, %s3180_s29  ;;  %v1558_v54 = vpop.f32.mrf.mxu1  ;;  %v4509_v17 = vpop.permute.xlu0 %2218  ;;  %v1312_v35 = vadd.f32 %v4435_v11, %v1189_v50 }
 0x303   : > { %v4495_v25 = vadd.f32 %v1558_v54, %v1309_v15  ;;  %v1024_v47 = vld [vmem:[#allocation2 + $0x108] sm:$0xff]  ;;  %4932 = vst [vmem:[#allocation10_spill] sm:$0xff] %v4509_v17  ;;  %v1395_v15 = vld [vmem:[#allocation2 + $0x110] sm:$0xff]  ;;  %v1320_v54 = vpop.f32.mrf.mxu0 }
 0x304   : > { %2970 = vmatmul.msk.f32.gmra.mxu2 %vm949_vm3, %v1024_v47  ;;  %3039 = vmatmul.msk.f32.vlgmr.msra.gmra.mxu3 %vm949_vm3, %v1024_v47 }
 0x305   : > { %v1705_v24 = vrot.slane %v4495_v25, 7  ;;  %v2026_v33 = vrot.slane %v4495_v25, 1 }
 0x307   : > { %v1192_v5 = vpop.f32.mrf.mxu2  ;;  %v2027_v41 = vsel %vm2000_vm6, %v2024_v45, %v2026_v33  ;;  %v1706_v60 = vsel %vm1679_vm5, %v1703_v46, %v1705_v24  ;;  %v4519_v46 = vpop.permute.xlu2 %2214 }
 0x308   : > { %v2237_v30 = vmul.f32 %v4345_v58, %v2027_v41  ;;  %v1981_v42 = vmul.f32 %v4128_v10, %v1706_v60  ;;  %4934 = vst [vmem:[#allocation12_spill] sm:$0xff] %v4519_v46  ;;  %v4531_v17 = vpop.permute.xlu1 %2222 }
 0x309   : > { %4936 = vst [vmem:[#allocation14_spill] sm:$0xff] %v4531_v17 }
 0x30a   : > { %2473 = vrot.lane.b32.xlu1 %v2237_v30, %s3181_s14  ;;  %2315 = vrot.lane.b32.xlu0 %v1981_v42, %s3180_s29  ;;  %v1561_v47 = vpop.f32.mrf.mxu1  ;;  %v1315_v42 = vadd.f32 %v1314_v1, %v1192_v5 }
 0x30b   : > { %v4514_v45 = vadd.f32 %v1561_v47, %v1312_v35  ;;  %v1396_v35 = vld [vmem:[#allocation2 + $0x118] sm:$0xff]  ;;  %v4527_v47 = vpop.permute.xlu0 %2580 }
 0x30c   : > { %3040 = vmatmul.msk.f32.gmra.mxu3 %vm949_vm3, %v1395_v15 }
 0x30d   : > { %4933 = vst [vmem:[#allocation11_spill] sm:$0xff] %v4514_v45  ;;  %v1707_v58 = vrot.slane %v4514_v45, 7  ;;  %v2028_v10 = vrot.slane %v4514_v45, 1 }
 0x30f   : > { %v1195_v41 = vpop.f32.mrf.mxu2  ;;  %v2029_v11 = vsel %vm2000_vm6, %v2026_v33, %v2028_v10  ;;  %v1708_v50 = vsel %vm1679_vm5, %v1705_v24, %v1707_v58  ;;  %v1323_v33 = vpop.f32.mrf.mxu0 }
 0x310   : > { %v2238_v60 = vmul.f32 %v4367_v18, %v2029_v11  ;;  %v1982_v30 = vmul.f32 %v4133_v36, %v1708_v50  ;;  %v2290_v1 = vpop.permute.xlu2 %2289 }
 0x312   : > { %2475 = vrot.lane.b32.xlu2 %v2238_v60, %s3181_s14  ;;  %2317 = vrot.lane.b32.xlu1 %v1982_v30, %s3180_s29  ;;  %v1564_v15 = vpop.f32.mrf.mxu1  ;;  %v1318_v30 = vadd.f32 %v1317_v34, %v1195_v41 }
 0x313   : > { %v4529_v45 = vadd.f32 %v1564_v15, %v1315_v42 }
 0x314   : > { %3041 = vmatmul.msk.f32.gmra.mxu3 %vm949_vm3, %v1396_v35  ;;  %v2385_v35 = vadd.f32 %v2290_v1, %v4217_v14 }
 0x315   : > { %4935 = vst [vmem:[#allocation13_spill] sm:$0xff] %v4529_v45  ;;  %v1709_v18 = vrot.slane %v4529_v45, 7  ;;  %v2030_v36 = vrot.slane %v4529_v45, 1 }
 0x317   : > { %v1198_v24 = vpop.f32.mrf.mxu2  ;;  %v2031_v5 = vsel %vm2000_vm6, %v2028_v10, %v2030_v36  ;;  %v1710_v11 = vsel %vm1679_vm5, %v1707_v58, %v1709_v18 }
 0x318   : > { %v2239_v50 = vmul.f32 %v4383_v53, %v2031_v5  ;;  %v1983_v60 = vmul.f32 %v4147_v40, %v1710_v11  ;;  %v2452_v53 = vpop.permute.xlu2 %2451  ;;  %v1326_v5 = vpop.f32.mrf.mxu0  ;;  %v1321_v1 = vadd.f32 %v1320_v54, %v1198_v24 }
 0x31a   : > { %2477 = vrot.lane.b32.xlu0 %v2239_v50, %s3181_s14  ;;  %2319 = vrot.lane.b32.xlu2 %v1983_v60, %s3180_s29  ;;  %v1567_v42 = vpop.f32.mrf.mxu1 }
 0x31b   : > { %v4543_v15 = vadd.f32 %v1567_v42, %v1318_v30 }
 0x31c   : > { %v2450_v45 = vpop.permute.xlu1 %2449  ;;  %v2292_v17 = vpop.permute.xlu0 %2291 }
 0x31d   : > { %v1711_v10 = vrot.slane %v4543_v15, 7  ;;  %v2545_v46 = vadd.f32 %v2450_v45, %v2385_v35  ;;  %v2386_v58 = vadd.f32 %v2292_v17, %v4235_v9  ;;  %v2032_v50 = vrot.slane %v4543_v15, 1 }
 0x31f   : > { %v2583_v40 = vadd.f32 %v4527_v47, %v2545_v46  ;;  %v2546_v34 = vadd.f32 %v2452_v53, %v2386_v58  ;;  %v1201_v41 = vpop.f32.mrf.mxu2  ;;  %v1712_v11 = vsel %vm1679_vm5, %v1709_v18, %v1711_v10  ;;  %v2033_v45 = vsel %vm2000_vm6, %v2030_v36, %v2032_v50 }
 0x320   : > { %v1984_v14 = vmul.f32 %v4145_v38, %v1712_v11  ;;  %v2240_v30 = vmul.f32 %v4372_v51, %v2033_v45  ;;  %v1329_v54 = vpop.f32.mrf.mxu0  ;;  %v1324_v58 = vadd.f32 %v1323_v33, %v1201_v41  ;;  %v2296_v11 = vpop.permute.xlu2 %2295 }
 0x321   : > { %2647 = vrot.lane.b32.xlu1 %v2583_v40, %s3181_s14  ;;  %v2584_v60 = vadd.f32 %v4527_v47, %v2546_v34 }
 0x322   : > { %2321 = vrot.lane.b32.xlu0 %v1984_v14, %s3180_s29  ;;  %v1570_v9 = vpop.f32.mrf.mxu1 }
 0x323   : > { %v4554_v17 = vadd.f32 %v1570_v9, %v1321_v1  ;;  %2649 = vrot.lane.b32.xlu2 %v2584_v60, %s3181_s14 }
 0x324   : > { %v2294_v42 = vpop.permute.xlu1 %2293 }
 0x325   : > { %v2034_v46 = vrot.slane %v4554_v17, 1  ;;  %v1713_v24 = vrot.slane %v4554_v17, 7  ;;  %v2387_v40 = vadd.f32 %v2294_v42, %v4256_v4 }
 0x327   : > { %v1204_v18 = vpop.f32.mrf.mxu2  ;;  %v2035_v38 = vsel %vm2000_vm6, %v2032_v50, %v2034_v46  ;;  %v1714_v51 = vsel %vm1679_vm5, %v1711_v10, %v1713_v24 }
 0x328   : > { %v2241_v35 = vmul.f32 %v4395_v62, %v2035_v38  ;;  %v1985_v33 = vmul.f32 %v4157_v28, %v1714_v51  ;;  %v1332_v10 = vpop.f32.mrf.mxu0  ;;  %v1327_v9 = vadd.f32 %v1326_v5, %v1204_v18 }
 0x329   : > { %2479 = vrot.lane.b32.xlu1 %v2240_v30, %s3181_s14  ;;  %v2388_v30 = vadd.f32 %v2296_v11, %v4274_v52 }
 0x32a   : > { %v1573_v53 = vpop.f32.mrf.mxu1 }
 0x32b   : > { %v4565_v36 = vadd.f32 %v1573_v53, %v1324_v58  ;;  %2481 = vrot.lane.b32.xlu2 %v2241_v35, %s3181_s14  ;;  %v2458_v35 = vpop.permute.xlu2 %2457 }
 0x32c   : > { %v2454_v34 = vpop.permute.xlu0 %2453 }
 0x32d   : > { %v1715_v50 = vrot.slane %v4565_v36, 7  ;;  %v2547_v14 = vadd.f32 %v2454_v34, %v2387_v40  ;;  %v2036_v4 = vrot.slane %v4565_v36, 1 }
 0x32f   : > { %v2585_v1 = vadd.f32 %v4527_v47, %v2547_v14  ;;  %v1207_v62 = vpop.f32.mrf.mxu2  ;;  %v1716_v41 = vsel %vm1679_vm5, %v1713_v24, %v1715_v50  ;;  %v2037_v24 = vsel %vm2000_vm6, %v2034_v46, %v2036_v4 }
 0x330   : > { %v1986_v60 = vmul.f32 %v4168_v49, %v1716_v41  ;;  %v2242_v5 = vmul.f32 %v4415_v19, %v2037_v24  ;;  %v1330_v51 = vadd.f32 %v1329_v54, %v1207_v62 }
 0x331   : > { %2651 = vrot.lane.b32.xlu0 %v2585_v1, %s3181_s14  ;;  %2323 = vrot.lane.b32.xlu1 %v1985_v33, %s3180_s29 }
 0x332   : > { %v1576_v45 = vpop.f32.mrf.mxu1 }
 0x333   : > { %2325 = vrot.lane.b32.xlu2 %v1986_v60, %s3180_s29  ;;  %v4579_v38 = vadd.f32 %v1576_v45, %v1327_v9  ;;  %v2302_v41 = vpop.permute.xlu2 %2301 }
 0x334   : > { %v2456_v28 = vpop.permute.xlu1 %2455  ;;  %v2298_v42 = vpop.permute.xlu0 %2297 }
 0x335   : > { %v2548_v58 = vadd.f32 %v2456_v28, %v2388_v30  ;;  %v2389_v49 = vadd.f32 %v2298_v42, %v4294_v37  ;;  %v1717_v52 = vrot.slane %v4579_v38, 7  ;;  %v2038_v18 = vrot.slane %v4579_v38, 1  ;;  %v1335_v37 = vpop.f32.mrf.mxu0 }
 0x337   : > { %v2586_v53 = vadd.f32 %v4527_v47, %v2548_v58  ;;  %v2549_v40 = vadd.f32 %v2458_v35, %v2389_v49  ;;  %v1210_v34 = vpop.f32.mrf.mxu2  ;;  %v2039_v1 = vsel %vm2000_vm6, %v2036_v4, %v2038_v18  ;;  %v1718_v19 = vsel %vm1679_vm5, %v1715_v50, %v1717_v52 }
 0x338   : > { %v2243_v62 = vmul.f32 %v4401_v23, %v2039_v1  ;;  %v1987_v60 = vmul.f32 %v4161_v8, %v1718_v19  ;;  %v1333_v42 = vadd.f32 %v1332_v10, %v1210_v34 }
 0x339   : > { %2653 = vrot.lane.b32.xlu1 %v2586_v53, %s3181_s14  ;;  %2483 = vrot.lane.b32.xlu0 %v2242_v5, %s3181_s14  ;;  %v2587_v46 = vadd.f32 %v4527_v47, %v2549_v40 }
 0x33a   : > { %v1579_v11 = vpop.f32.mrf.mxu1 }
 0x33b   : > { %v4590_v14 = vadd.f32 %v1579_v11, %v1330_v51  ;;  %2655 = vrot.lane.b32.xlu2 %v2587_v46, %s3181_s14  ;;  %v2391_v51 = vadd.f32 %v2302_v41, %v4338_v27 }
 0x33c   : > { %v2300_v30 = vpop.permute.xlu1 %2299 }
 0x33d   : > { %v2040_v33 = vrot.slane %v4590_v14, 1  ;;  %v1719_v45 = vrot.slane %v4590_v14, 7  ;;  %v2390_v4 = vadd.f32 %v2300_v30, %v4316_v2  ;;  %v1338_v49 = vpop.f32.mrf.mxu0 }
 0x33f   : > { %v1213_v54 = vpop.f32.mrf.mxu2  ;;  %v2041_v9 = vsel %vm2000_vm6, %v2038_v18, %v2040_v33  ;;  %v1720_v23 = vsel %vm1679_vm5, %v1717_v52, %v1719_v45 }
 0x340   : > { %v2244_v28 = vmul.f32 %v4424_v21, %v2041_v9  ;;  %v2464_v21 = vpop.permute.xlu2 %2463  ;;  %v1988_v40 = vmul.f32 %v4171_v44, %v1720_v23  ;;  %v1336_v52 = vadd.f32 %v1335_v37, %v1213_v54 }
 0x341   : > { %2485 = vrot.lane.b32.xlu1 %v2243_v62, %s3181_s14  ;;  %2327 = vrot.lane.b32.xlu0 %v1987_v60, %s3180_s29 }
 0x342   : > { %v1582_v50 = vpop.f32.mrf.mxu1 }
 0x343   : > { %v4604_v24 = vadd.f32 %v1582_v50, %v1333_v42  ;;  %2487 = vrot.lane.b32.xlu2 %v2244_v28, %s3181_s14 }
 0x344   : > { %v2460_v8 = vpop.permute.xlu0 %2459 }
 0x345   : > { %v1721_v35 = vrot.slane %v4604_v24, 7  ;;  %v2550_v58 = vadd.f32 %v2460_v8, %v2390_v4  ;;  %v2042_v2 = vrot.slane %v4604_v24, 1  ;;  %v1341_v41 = vpop.f32.mrf.mxu0 }
 0x347   : > { %v2588_v10 = vadd.f32 %v4527_v47, %v2550_v58  ;;  %v1216_v53 = vpop.f32.mrf.mxu2  ;;  %v1722_v34 = vsel %vm1679_vm5, %v1719_v45, %v1721_v35  ;;  %v2043_v1 = vsel %vm2000_vm6, %v2040_v33, %v2042_v2 }
 0x348   : > { %v1989_v5 = vmul.f32 %v4185_v59, %v1722_v34  ;;  %v2245_v37 = vmul.f32 %v4443_v26, %v2043_v1  ;;  %v2308_v45 = vpop.permute.xlu2 %2307  ;;  %v1339_v30 = vadd.f32 %v1338_v49, %v1216_v53 }
 0x349   : > { %2657 = vrot.lane.b32.xlu0 %v2588_v10, %s3181_s14  ;;  %2329 = vrot.lane.b32.xlu1 %v1988_v40, %s3180_s29 }
 0x34a   : > { %v1585_v18 = vpop.f32.mrf.mxu1 }
 0x34b   : > { %2331 = vrot.lane.b32.xlu2 %v1989_v5, %s3180_s29  ;;  %v4618_v46 = vadd.f32 %v1585_v18, %v1336_v52 }
 0x34c   : > { %v2462_v11 = vpop.permute.xlu1 %2461  ;;  %v2304_v44 = vpop.permute.xlu0 %2303 }
 0x34d   : > { %v2551_v19 = vadd.f32 %v2462_v11, %v2391_v51  ;;  %v2392_v62 = vadd.f32 %v2304_v44, %v4360_v16  ;;  %v1723_v54 = vrot.slane %v4618_v46, 7  ;;  %v2044_v27 = vrot.slane %v4618_v46, 1  ;;  %v1344_v34 = vpop.f32.mrf.mxu0 }
 0x34f   : > { %v2589_v59 = vadd.f32 %v4527_v47, %v2551_v19  ;;  %v2552_v60 = vadd.f32 %v2464_v21, %v2392_v62  ;;  %v1219_v9 = vpop.f32.mrf.mxu2  ;;  %v2045_v26 = vsel %vm2000_vm6, %v2042_v2, %v2044_v27  ;;  %v1724_v42 = vsel %vm1679_vm5, %v1721_v35, %v1723_v54 }
 0x350   : > { %v2246_v8 = vmul.f32 %v4429_v31, %v2045_v26  ;;  %v1990_v23 = vmul.f32 %v4182_v56, %v1724_v42  ;;  %v1342_v53 = vadd.f32 %v1341_v41, %v1219_v9 }
 0x351   : > { %v2590_v28 = vadd.f32 %v4527_v47, %v2552_v60  ;;  %2659 = vrot.lane.b32.xlu1 %v2589_v59, %s3181_s14  ;;  %2489 = vrot.lane.b32.xlu0 %v2245_v37, %s3181_s14  ;;  %v2394_v59 = vadd.f32 %v2308_v45, %v4408_v63 }
 0x352   : > { %v1588_v16 = vpop.f32.mrf.mxu1 }
 0x353   : > { %v4629_v33 = vadd.f32 %v1588_v16, %v1339_v30  ;;  %2661 = vrot.lane.b32.xlu2 %v2590_v28, %s3181_s14 }
 0x354   : > { %v2306_v21 = vpop.permute.xlu1 %2305  ;;  %v2470_v40 = vpop.permute.xlu2 %2469 }
 0x355   : > { %v2046_v50 = vrot.slane %v4629_v33, 1  ;;  %v1725_v49 = vrot.slane %v4629_v33, 7  ;;  %v2393_v2 = vadd.f32 %v2306_v21, %v4385_v43 }
 0x357   : > { %v1222_v4 = vpop.f32.mrf.mxu2  ;;  %v2047_v58 = vsel %vm2000_vm6, %v2044_v27, %v2046_v50  ;;  %v1726_v5 = vsel %vm1679_vm5, %v1723_v54, %v1725_v49  ;;  %v1347_v27 = vpop.f32.mrf.mxu0 }
 0x358   : > { %v2247_v10 = vmul.f32 %v4456_v12, %v2047_v58  ;;  %v1991_v51 = vmul.f32 %v4187_v57, %v1726_v5  ;;  %v1345_v19 = vadd.f32 %v1344_v34, %v1222_v4 }
 0x359   : > { %2491 = vrot.lane.b32.xlu1 %v2246_v8, %s3181_s14  ;;  %2333 = vrot.lane.b32.xlu0 %v1990_v23, %s3180_s29 }
 0x35a   : > { %v1591_v35 = vpop.f32.mrf.mxu1 }
 0x35b   : > { %v4643_v31 = vadd.f32 %v1591_v35, %v1342_v53  ;;  %2493 = vrot.lane.b32.xlu2 %v2247_v10, %s3181_s14 }
 0x35c   : > { %v2466_v56 = vpop.permute.xlu0 %2465  ;;  %v2314_v60 = vpop.permute.xlu2 %2313 }
 0x35d   : > { %v1727_v52 = vrot.slane %v4643_v31, 7  ;;  %v2553_v12 = vadd.f32 %v2466_v56, %v2393_v2  ;;  %v2048_v44 = vrot.slane %v4643_v31, 1 }
 0x35f   : > { %v2591_v18 = vadd.f32 %v4527_v47, %v2553_v12  ;;  %v1728_v11 = vsel %vm1679_vm5, %v1725_v49, %v1727_v52  ;;  %v1225_v1 = vpop.f32.mrf.mxu2  ;;  %v2049_v54 = vsel %vm2000_vm6, %v2046_v50, %v2048_v44  ;;  %v1350_v21 = vpop.f32.mrf.mxu0 }
 0x360   : > { %v1992_v43 = vmul.f32 %v4199_v32, %v1728_v11  ;;  %v2248_v16 = vmul.f32 %v4470_v6, %v2049_v54  ;;  %v1348_v26 = vadd.f32 %v1347_v27, %v1225_v1  ;;  %v2397_v54 = vadd.f32 %v2314_v60, %v4475_v61 }
 0x361   : > { %2663 = vrot.lane.b32.xlu0 %v2591_v18, %s3181_s14  ;;  %2335 = vrot.lane.b32.xlu1 %v1991_v51, %s3180_s29 }
 0x362   : > { %v1594_v62 = vpop.f32.mrf.mxu1 }
 0x363   : > { %2337 = vrot.lane.b32.xlu2 %v1992_v43, %s3180_s29  ;;  %v4657_v9 = vadd.f32 %v1594_v62, %v1345_v19 }
 0x364   : > { %v2468_v57 = vpop.permute.xlu1 %2467  ;;  %v2310_v37 = vpop.permute.xlu0 %2309 }
 0x365   : > { %v2554_v32 = vadd.f32 %v2468_v57, %v2394_v59  ;;  %v2395_v41 = vadd.f32 %v2310_v37, %v4431_v48  ;;  %v1729_v63 = vrot.slane %v4657_v9, 7  ;;  %v2050_v45 = vrot.slane %v4657_v9, 1 }
 0x367   : > { %v2592_v30 = vadd.f32 %v4527_v47, %v2554_v32  ;;  %v2555_v28 = vadd.f32 %v2470_v40, %v2395_v41  ;;  %v1228_v4 = vpop.f32.mrf.mxu2  ;;  %v4668_v8 = vpop.f32.mrf.mxu3  ;;  %v2051_v23 = vsel %vm2000_vm6, %v2048_v44, %v2050_v45  ;;  %v1730_v58 = vsel %vm1679_vm5, %v1727_v52, %v1729_v63 }
 0x368   : > { %v2249_v10 = vmul.f32 %v4461_v29, %v2051_v23  ;;  %v1993_v53 = vmul.f32 %v4197_v0, %v1730_v58  ;;  %v1351_v56 = vadd.f32 %v1350_v21, %v1228_v4  ;;  %v1353_v59 = vpop.f32.mrf.mxu0  ;;  %v4937_v21 = vld [vmem:[#allocation6_spill] sm:$0xff] }
 0x369   : > { %v2593_v42 = vadd.f32 %v4527_v47, %v2555_v28  ;;  %2665 = vrot.lane.b32.xlu1 %v2592_v30, %s3181_s14  ;;  %2495 = vrot.lane.b32.xlu0 %v2248_v16, %s3181_s14 }
 0x36a   : > { %v1597_v50 = vpop.f32.mrf.mxu1 }
 0x36b   : > { %v4670_v48 = vadd.f32 %v1597_v50, %v1348_v26  ;;  %2667 = vrot.lane.b32.xlu2 %v2593_v42, %s3181_s14 }
 0x36c   : > { %v2476_v6 = vpop.permute.xlu2 %2475  ;;  %v2312_v34 = vpop.permute.xlu1 %2311 }
 0x36d   : > { %v2052_v49 = vrot.slane %v4670_v48, 1  ;;  %v1731_v35 = vrot.slane %v4670_v48, 7  ;;  %v2396_v52 = vadd.f32 %v2312_v34, %v4452_v55 }
 0x36f   : > { %v2053_v40 = vsel %vm2000_vm6, %v2050_v45, %v2052_v49  ;;  %v1732_v18 = vsel %vm1679_vm5, %v1729_v63, %v1731_v35  ;;  %v1231_v51 = vpop.f32.mrf.mxu2 }
 0x370   : > { %v2250_v2 = vmul.f32 %v4484_v13, %v2053_v40  ;;  %v1359_v13 = vpop.f32.mrf.mxu3  ;;  %v1994_v55 = vmul.f32 %v4203_v7, %v1732_v18  ;;  %v1354_v57 = vadd.f32 %v1353_v59, %v1231_v51 }
 0x371   : > { %2497 = vrot.lane.b32.xlu1 %v2249_v10, %s3181_s14  ;;  %2339 = vrot.lane.b32.xlu0 %v1993_v53, %s3180_s29 }
 0x372   : > { %v1600_v5 = vpop.f32.mrf.mxu1 }
 0x373   : > { %v4684_v12 = vadd.f32 %v1600_v5, %v1351_v56  ;;  %2499 = vrot.lane.b32.xlu2 %v2250_v2, %s3181_s14 }
 0x374   : > { %v2472_v0 = vpop.permute.xlu0 %2471  ;;  %v4687_v29 = vpop.permute.xlu2 %2319 }
 0x375   : > { %v1733_v11 = vrot.slane %v4684_v12, 7  ;;  %v2556_v44 = vadd.f32 %v2472_v0, %v2396_v52  ;;  %v2054_v19 = vrot.slane %v4684_v12, 1  ;;  %v4938_v52 = vld [vmem:[#allocation7_spill] sm:$0xff] }
 0x377   : > { %v2594_v43 = vadd.f32 %v4527_v47, %v2556_v44  ;;  %v1734_v1 = vsel %vm1679_vm5, %v1731_v35, %v1733_v11  ;;  %v1234_v63 = vpop.f32.mrf.mxu2 }
 0x378   : > { %v1995_v62 = vmul.f32 %v4215_v20, %v1734_v1  ;;  %v2055_v20 = vsel %vm2000_vm6, %v2052_v49, %v2054_v19  ;;  %v1362_v45 = vpop.f32.mrf.mxu3  ;;  %v1357_v58 = vadd.f32 %v4668_v8, %v1234_v63 }
 0x379   : > { %2669 = vrot.lane.b32.xlu0 %v2594_v43, %s3181_s14  ;;  %2341 = vrot.lane.b32.xlu1 %v1994_v55, %s3180_s29  ;;  %v2251_v60 = vmul.f32 %v4497_v22, %v2055_v20 }
 0x37a   : > { %v1603_v37 = vpop.f32.mrf.mxu1 }
 0x37b   : > { %2343 = vrot.lane.b32.xlu2 %v1995_v62, %s3180_s29  ;;  %v4703_v7 = vadd.f32 %v1603_v37, %v1354_v57  ;;  %v4939_v57 = vld [vmem:[#allocation12_spill] sm:$0xff] }
 0x37c   : > { %v2474_v27 = vpop.permute.xlu1 %2473  ;;  %v2316_v32 = vpop.permute.xlu0 %2315 }
 0x37d   : > { %v2557_v41 = vadd.f32 %v2474_v27, %v2397_v54  ;;  %v2398_v30 = vadd.f32 %v2316_v32, %v4495_v25  ;;  %v2650_v28 = vpop.permute.xlu2 %2649  ;;  %v1735_v42 = vrot.slane %v4703_v7, 7  ;;  %v2056_v50 = vrot.slane %v4703_v7, 1  ;;  %v4940_v54 = vld [vmem:[#allocation9_spill] sm:$0xff] }
 0x37e   : > { %v2745_v16 = vsel %vm2743_vm7, %v2650_v28, 0.0 }
 0x37f   : > { %v2595_v26 = vadd.f32 %v4527_v47, %v2557_v41  ;;  %v2558_v61 = vadd.f32 %v2476_v6, %v2398_v30  ;;  %2777 = vst [vmem:[%s4709_s21 + $0x8] sm:$0xff] %v2745_v16  ;;  %v2057_v4 = vsel %vm2000_vm6, %v2054_v19, %v2056_v50  ;;  %v1736_v6 = vsel %vm1679_vm5, %v1733_v11, %v1735_v42  ;;  %v1237_v40 = vpop.f32.mrf.mxu2 }
 0x380   : > { %v2252_v49 = vmul.f32 %v4486_v3, %v2057_v4  ;;  %v1996_v10 = vmul.f32 %v4937_v21, %v1736_v6  ;;  %v1360_v18 = vadd.f32 %v1359_v13, %v1237_v40  ;;  %v4942_v6 = vld [vmem:[#allocation10_spill] sm:$0xff]  ;;  %v4944_v21 = vld [vmem:[#allocation13_spill] sm:$0xff]  ;;  %v4945_v40 = vld [vmem:[#allocation11_spill] sm:$0xff] }
 0x381   : > { %v2596_v25 = vadd.f32 %v4527_v47, %v2558_v61  ;;  %2671 = vrot.lane.b32.xlu1 %v2595_v26, %s3181_s14  ;;  %2501 = vrot.lane.b32.xlu0 %v2251_v60, %s3181_s14 }
 0x383   : > { %2673 = vrot.lane.b32.xlu2 %v2596_v25, %s3181_s14  ;;  %v4941_v25 = vld [vmem:[#allocation14_spill] sm:$0xff] }
 0x384   : > { %v2318_v2 = vpop.permute.xlu1 %2317 }
 0x385   : > { %v2482_v23 = vpop.permute.xlu2 %2481 }
 0x387   : > { %v1606_v22 = vpop.f32.mrf.mxu3  ;;  %v1240_v1 = vpop.f32.mrf.mxu2 }
 0x388   : > { %v4724_v53 = vadd.f32 %v1606_v22, %v1357_v58  ;;  %v1363_v32 = vadd.f32 %v1362_v45, %v1240_v1  ;;  %v4943_v22 = vld [vmem:[#allocation8_spill] sm:$0xff] }
 0x389   : > { %2503 = vrot.lane.b32.xlu1 %v2252_v49, %s3181_s14  ;;  %2345 = vrot.lane.b32.xlu0 %v1996_v10, %s3180_s29  ;;  %v2400_v10 = vadd.f32 %v4687_v29, %v4944_v21 }
 0x38a   : > { %v1737_v35 = vrot.slane %v4724_v53, 7  ;;  %v2058_v34 = vrot.slane %v4724_v53, 1 }
 0x38c   : > { %v2059_v56 = vsel %vm2000_vm6, %v2056_v50, %v2058_v34  ;;  %v1738_v8 = vsel %vm1679_vm5, %v1735_v42, %v1737_v35  ;;  %v2478_v11 = vpop.permute.xlu0 %2477 }
 0x38d   : > { %v4732_v5 = vpop.permute.xlu2 %2325  ;;  %v2253_v3 = vmul.f32 %v4507_v39, %v2059_v56  ;;  %v1997_v0 = vmul.f32 %v4938_v52, %v1738_v8 }
 0x38f   : > { %2505 = vrot.lane.b32.xlu2 %v2253_v3, %s3181_s14  ;;  %v1609_v51 = vpop.f32.mrf.mxu3 }
 0x390   : > { %v4737_v44 = vadd.f32 %v1609_v51, %v1360_v18 }
 0x391   : > { %2347 = vrot.lane.b32.xlu1 %v1997_v0, %s3180_s29 }
 0x392   : > { %v1739_v43 = vrot.slane %v4737_v44, 7  ;;  %v2060_v55 = vrot.slane %v4737_v44, 1 }
 0x393   : > { %v2648_v19 = vpop.permute.xlu1 %2647 }
 0x394   : > { %v2744_v39 = vsel %vm2743_vm7, %v2648_v19, 0.0  ;;  %v2061_v62 = vsel %vm2000_vm6, %v2058_v34, %v2060_v55  ;;  %v1740_v13 = vsel %vm1679_vm5, %v1737_v35, %v1739_v43  ;;  %v2322_v28 = vpop.permute.xlu0 %2321  ;;  %v2399_v35 = vadd.f32 %v2318_v2, %v4945_v40 }
 0x395   : > { %2776 = vst [vmem:[%s4709_s21] sm:$0xff] %v2744_v39  ;;  %v2656_v59 = vpop.permute.xlu2 %2655  ;;  %v2254_v37 = vmul.f32 %v4939_v57, %v2061_v62  ;;  %v1998_v27 = vmul.f32 %v4940_v54, %v1740_v13  ;;  %v2401_v42 = vadd.f32 %v2322_v28, %v4543_v15  ;;  %v2403_v62 = vadd.f32 %v4732_v5, %v4565_v36 }
 0x396   : > { %v2748_v20 = vsel %vm2743_vm7, %v2656_v59, 0.0  ;;  %v2559_v56 = vadd.f32 %v2478_v11, %v2399_v35 }
 0x397   : > { %2780 = vst [vmem:[%s4709_s21 + $0x20] sm:$0xff] %v2748_v20  ;;  %2507 = vrot.lane.b32.xlu0 %v2254_v37, %s3181_s14  ;;  %2349 = vrot.lane.b32.xlu2 %v1998_v27, %s3180_s29  ;;  %v1612_v41 = vpop.f32.mrf.mxu3  ;;  %v2561_v15 = vadd.f32 %v2482_v23, %v2401_v42 }
 0x398   : > { %v4752_v30 = vadd.f32 %v1612_v41, %v1363_v32  ;;  %v2597_v51 = vadd.f32 %v4527_v47, %v2559_v56 }
 0x399   : > { %v2599_v0 = vadd.f32 %v4527_v47, %v2561_v15 }
 0x39a   : > { %v1741_v16 = vrot.slane %v4752_v30, 7  ;;  %v2062_v63 = vrot.slane %v4752_v30, 1 }
 0x39b   : > { %v2480_v26 = vpop.permute.xlu1 %2479 }
 0x39c   : > { %v2096_v61 = vsel %vm2000_vm6, %v2062_v63, 0.0  ;;  %v2063_v45 = vsel %vm2000_vm6, %v2060_v55, %v2062_v63  ;;  %v1742_v60 = vsel %vm1679_vm5, %v1739_v43, %v1741_v16  ;;  %v2560_v34 = vadd.f32 %v2480_v26, %v2400_v10 }
 0x39d   : > { %v2488_v50 = vpop.permute.xlu2 %2487  ;;  %v2256_v4 = vmul.f32 %v4941_v25, %v2096_v61  ;;  %v2255_v58 = vmul.f32 %v4942_v6, %v2063_v45  ;;  %v1999_v49 = vmul.f32 %v4943_v22, %v1742_v60 }
 0x39e   : > { %v2598_v29 = vadd.f32 %v4527_v47, %v2560_v34 }
 0x39f   : > { %2511 = vrot.lane.b32.xlu2 %v2256_v4, %s3181_s14  ;;  %2509 = vrot.lane.b32.xlu1 %v2255_v58, %s3181_s14 }
 0x3a0   : > { %2351 = vrot.lane.b32.xlu0 %v1999_v49, %s3180_s29 }
 0x3a3   : > { %v2652_v8 = vpop.permute.xlu0 %2651  ;;  %v2324_v3 = vpop.permute.xlu1 %2323 }
 0x3a4   : > { %v2746_v52 = vsel %vm2743_vm7, %v2652_v8, 0.0  ;;  %v2402_v23 = vadd.f32 %v2324_v3, %v4554_v17 }
 0x3a5   : > { %2778 = vst [vmem:[%s4709_s21 + $0x10] sm:$0xff] %v2746_v52  ;;  %v2332_v18 = vpop.permute.xlu2 %2331 }
 0x3a6   : > { %v2406_v42 = vadd.f32 %v2332_v18, %v4604_v24 }
 0x3a7   : > { %2679 = vrot.lane.b32.xlu2 %v2599_v0, %s3181_s14  ;;  %2677 = vrot.lane.b32.xlu1 %v2598_v29, %s3181_s14 }
 0x3a8   : > { %2675 = vrot.lane.b32.xlu0 %v2597_v51, %s3181_s14 }
 0x3ab   : > { %v2654_v2 = vpop.permute.xlu1 %2653  ;;  %v2484_v11 = vpop.permute.xlu0 %2483 }
 0x3ac   : > { %v2747_v43 = vsel %vm2743_vm7, %v2654_v2, 0.0  ;;  %v2562_v55 = vadd.f32 %v2484_v11, %v2402_v23 }
 0x3ad   : > { %2779 = vst [vmem:[%s4709_s21 + $0x18] sm:$0xff] %v2747_v43  ;;  %v2662_v1 = vpop.permute.xlu2 %2661 }
 0x3ae   : > { %v2600_v19 = vadd.f32 %v4527_v47, %v2562_v55  ;;  %v2751_v39 = vsel %vm2743_vm7, %v2662_v1, 0.0 }
 0x3af   : > { %2783 = vst [vmem:[%s4709_s21 + $0x38] sm:$0xff] %v2751_v39 }
 0x3b0   : > { %2681 = vrot.lane.b32.xlu0 %v2600_v19, %s3181_s14 }
 0x3b3   : > { %v2486_v13 = vpop.permute.xlu1 %2485  ;;  %v2328_v17 = vpop.permute.xlu0 %2327 }
 0x3b4   : > { %v2563_v59 = vadd.f32 %v2486_v13, %v2403_v62  ;;  %v2404_v57 = vadd.f32 %v2328_v17, %v4579_v38 }
 0x3b5   : > { %v2494_v37 = vpop.permute.xlu2 %2493 }
 0x3b6   : > { %v2601_v54 = vadd.f32 %v4527_v47, %v2563_v59  ;;  %v2564_v27 = vadd.f32 %v2488_v50, %v2404_v57 }
 0x3b8   : > { %v2602_v32 = vadd.f32 %v4527_v47, %v2564_v27  ;;  %2683 = vrot.lane.b32.xlu1 %v2601_v54, %s3181_s14 }
 0x3ba   : > { %2685 = vrot.lane.b32.xlu2 %v2602_v32, %s3181_s14 }
 0x3bb   : > { %v2658_v20 = vpop.permute.xlu0 %2657  ;;  %v2330_v41 = vpop.permute.xlu1 %2329 }
 0x3bc   : > { %v2749_v36 = vsel %vm2743_vm7, %v2658_v20, 0.0  ;;  %v2405_v38 = vadd.f32 %v2330_v41, %v4590_v14 }
 0x3bd   : > { %2781 = vst [vmem:[%s4709_s21 + $0x28] sm:$0xff] %v2749_v36  ;;  %v2338_v5 = vpop.permute.xlu2 %2337 }
 0x3be   : > { %v2409_v0 = vadd.f32 %v2338_v5, %v4643_v31 }
 0x3c3   : > { %v2660_v28 = vpop.permute.xlu1 %2659  ;;  %v2490_v16 = vpop.permute.xlu0 %2489 }
 0x3c4   : > { %v2750_v63 = vsel %vm2743_vm7, %v2660_v28, 0.0  ;;  %v2565_v26 = vadd.f32 %v2490_v16, %v2405_v38 }
 0x3c5   : > { %2782 = vst [vmem:[%s4709_s21 + $0x30] sm:$0xff] %v2750_v63  ;;  %v2668_v61 = vpop.permute.xlu2 %2667 }
 0x3c6   : > { %v2603_v45 = vadd.f32 %v4527_v47, %v2565_v26  ;;  %v2754_v60 = vsel %vm2743_vm7, %v2668_v61, 0.0 }
 0x3c7   : > { %2786 = vst [vmem:[%s4709_s21 + $0x50] sm:$0xff] %v2754_v60 }
 0x3c8   : > { %2687 = vrot.lane.b32.xlu0 %v2603_v45, %s3181_s14 }
 0x3cb   : > { %v2492_v50 = vpop.permute.xlu1 %2491  ;;  %v2334_v25 = vpop.permute.xlu0 %2333 }
 0x3cc   : > { %v2566_v14 = vadd.f32 %v2492_v50, %v2406_v42  ;;  %v2407_v4 = vadd.f32 %v2334_v25, %v4618_v46 }
 0x3cd   : > { %v2500_v6 = vpop.permute.xlu2 %2499 }
 0x3ce   : > { %v2604_v58 = vadd.f32 %v4527_v47, %v2566_v14  ;;  %v2567_v22 = vadd.f32 %v2494_v37, %v2407_v4 }
 0x3d0   : > { %v2605_v49 = vadd.f32 %v4527_v47, %v2567_v22  ;;  %2689 = vrot.lane.b32.xlu1 %v2604_v58, %s3181_s14 }
 0x3d2   : > { %2691 = vrot.lane.b32.xlu2 %v2605_v49, %s3181_s14 }
 0x3d3   : > { %v2664_v21 = vpop.permute.xlu0 %2663  ;;  %v2336_v10 = vpop.permute.xlu1 %2335 }
 0x3d4   : > { %v2752_v24 = vsel %vm2743_vm7, %v2664_v21, 0.0  ;;  %v2408_v46 = vadd.f32 %v2336_v10, %v4629_v33 }
 0x3d5   : > { %2784 = vst [vmem:[%s4709_s21 + $0x40] sm:$0xff] %v2752_v24  ;;  %v2344_v40 = vpop.permute.xlu2 %2343 }
 0x3d6   : > { %v2412_v37 = vadd.f32 %v2344_v40, %v4684_v12 }
 0x3db   : > { %v2666_v35 = vpop.permute.xlu1 %2665  ;;  %v2496_v15 = vpop.permute.xlu0 %2495 }
 0x3dc   : > { %v2753_v34 = vsel %vm2743_vm7, %v2666_v35, 0.0  ;;  %v2568_v56 = vadd.f32 %v2496_v15, %v2408_v46 }
 0x3dd   : > { %2785 = vst [vmem:[%s4709_s21 + $0x48] sm:$0xff] %v2753_v34  ;;  %v2674_v8 = vpop.permute.xlu2 %2673 }
 0x3de   : > { %v2606_v3 = vadd.f32 %v4527_v47, %v2568_v56  ;;  %v2757_v52 = vsel %vm2743_vm7, %v2674_v8, 0.0 }
 0x3df   : > { %2789 = vst [vmem:[%s4709_s21 + $0x68] sm:$0xff] %v2757_v52 }
 0x3e0   : > { %2693 = vrot.lane.b32.xlu0 %v2606_v3, %s3181_s14 }
 0x3e3   : > { %v2498_v29 = vpop.permute.xlu1 %2497  ;;  %v2340_v18 = vpop.permute.xlu0 %2339 }
 0x3e4   : > { %v2569_v33 = vadd.f32 %v2498_v29, %v2409_v0  ;;  %v2410_v51 = vadd.f32 %v2340_v18, %v4657_v9 }
 0x3e6   : > { %v2607_v23 = vadd.f32 %v4527_v47, %v2569_v33  ;;  %v2570_v2 = vadd.f32 %v2500_v6, %v2410_v51 }
 0x3e8   : > { %v2608_v11 = vadd.f32 %v4527_v47, %v2570_v2  ;;  %2695 = vrot.lane.b32.xlu1 %v2607_v23, %s3181_s14 }
 0x3e9   : > { %v2506_v43 = vpop.permute.xlu2 %2505 }
 0x3ea   : > { %2697 = vrot.lane.b32.xlu2 %v2608_v11, %s3181_s14 }
 0x3eb   : > { %v2670_v55 = vpop.permute.xlu0 %2669  ;;  %v2342_v1 = vpop.permute.xlu1 %2341 }
 0x3ec   : > { %v2755_v31 = vsel %vm2743_vm7, %v2670_v55, 0.0  ;;  %v2411_v39 = vadd.f32 %v2342_v1, %v4670_v48 }
 0x3ed   : > { %2787 = vst [vmem:[%s4709_s21 + $0x58] sm:$0xff] %v2755_v31 }
 0x3f1   : > { %v2350_v19 = vpop.permute.xlu2 %2349 }
 0x3f2   : > { %v2415_v26 = vadd.f32 %v2350_v19, %v4737_v44 }
 0x3f3   : > { %v2672_v9 = vpop.permute.xlu1 %2671  ;;  %v2502_v62 = vpop.permute.xlu0 %2501 }
 0x3f4   : > { %v2756_v13 = vsel %vm2743_vm7, %v2672_v9, 0.0  ;;  %v2571_v17 = vadd.f32 %v2502_v62, %v2411_v39 }
 0x3f5   : > { %2788 = vst [vmem:[%s4709_s21 + $0x60] sm:$0xff] %v2756_v13 }
 0x3f6   : > { %v2609_v59 = vadd.f32 %v4527_v47, %v2571_v17 }
 0x3f8   : > { %2699 = vrot.lane.b32.xlu0 %v2609_v59, %s3181_s14 }
 0x3f9   : > { %v2512_v57 = vpop.permute.xlu2 %2511 }
 0x3fb   : > { %v2504_v54 = vpop.permute.xlu1 %2503  ;;  %v2346_v27 = vpop.permute.xlu0 %2345 }
 0x3fc   : > { %v2572_v32 = vadd.f32 %v2504_v54, %v2412_v37  ;;  %v2413_v20 = vadd.f32 %v2346_v27, %v4703_v7 }
 0x3fe   : > { %v2610_v48 = vadd.f32 %v4527_v47, %v2572_v32  ;;  %v2573_v41 = vadd.f32 %v2506_v43, %v2413_v20 }
 0x400   : > { %v2611_v36 = vadd.f32 %v4527_v47, %v2573_v41  ;;  %2701 = vrot.lane.b32.xlu1 %v2610_v48, %s3181_s14 }
 0x401   : > { %v2680_v5 = vpop.permute.xlu2 %2679 }
 0x402   : > { %2703 = vrot.lane.b32.xlu2 %v2611_v36, %s3181_s14  ;;  %v2760_v38 = vsel %vm2743_vm7, %v2680_v5, 0.0 }
 0x403   : > { %2792 = vst [vmem:[%s4709_s21 + $0x80] sm:$0xff] %v2760_v38  ;;  %v2348_v12 = vpop.permute.xlu1 %2347 }
 0x404   : > { %v2414_v28 = vadd.f32 %v2348_v12, %v4724_v53 }
 0x409   : > { %v2508_v16 = vpop.permute.xlu0 %2507 }
 0x40a   : > { %v2574_v63 = vadd.f32 %v2508_v16, %v2414_v28 }
 0x40c   : > { %v2612_v7 = vadd.f32 %v4527_v47, %v2574_v63 }
 0x40e   : > { %2705 = vrot.lane.b32.xlu0 %v2612_v7, %s3181_s14 }
 0x411   : > { %v2510_v61 = vpop.permute.xlu1 %2509 }
 0x412   : > { %v2575_v45 = vadd.f32 %v2510_v61, %v2415_v26  ;;  %v2352_v60 = vpop.permute.xlu0 %2351 }
 0x413   : > { %v2416_v42 = vadd.f32 %v2352_v60, %v4752_v30 }
 0x414   : > { %v2613_v50 = vadd.f32 %v4527_v47, %v2575_v45  ;;  %v2686_v25 = vpop.permute.xlu2 %2685 }
 0x415   : > { %v2576_v53 = vadd.f32 %v2512_v57, %v2416_v42  ;;  %v2763_v14 = vsel %vm2743_vm7, %v2686_v25, 0.0 }
 0x416   : > { %2795 = vst [vmem:[%s4709_s21 + $0x98] sm:$0xff] %v2763_v14  ;;  %2707 = vrot.lane.b32.xlu1 %v2613_v50, %s3181_s14 }
 0x417   : > { %v2614_v44 = vadd.f32 %v4527_v47, %v2576_v53 }
 0x419   : > { %2709 = vrot.lane.b32.xlu2 %v2614_v44, %s3181_s14  ;;  %v2678_v4 = vpop.permute.xlu1 %2677  ;;  %s3128_s14 = scalar_lea.hbm %s3127_s13, 256 }
 0x41a   : > { %v2759_v6 = vsel %vm2743_vm7, %v2678_v4, 0.0  ;;  %v2676_v30 = vpop.permute.xlu0 %2675  ;;  %p3129_p11 = scmp.ne.s32.totalorder %s3127_s13, %s3128_s14  ;;  %p3134_p1 = scmp.lt.s32.totalorder %s3132_s22, %s3128_s14 }
 0x41b   : > { %2791 = vst [vmem:[%s4709_s21 + $0x78] sm:$0xff] %v2759_v6  ;;  %v2758_v58 = vsel %vm2743_vm7, %v2676_v30, 0.0 }
 0x41c   : > { %2790 = vst [vmem:[%s4709_s21 + $0x70] sm:$0xff] %v2758_v58  ;;  %p3130_p12 = pnand %p3129_p11, %p3271_p5  ;;  %p3135_p2 = por %p3134_p1, %p3133_p0 }
 0x41e   : > { %p3131_p13 = pneg %p3130_p12 }
 0x420   : > { %p3136_p3 = pnand %p3135_p2, %p3131_p13 }
 0x422   : > { %v2682_v22 = vpop.permute.xlu0 %2681 }
 0x423   : > { %v2761_v49 = vsel %vm2743_vm7, %v2682_v22, 0.0 }
 0x424   : > { %2793 = vst [vmem:[%s4709_s21 + $0x88] sm:$0xff] %v2761_v49 }
 0x42a   : > { %v2684_v21 = vpop.permute.xlu1 %2683 }
 0x42b   : > { %v2762_v47 = vsel %vm2743_vm7, %v2684_v21, 0.0 }
 0x42c   : > { %2794 = vst [vmem:[%s4709_s21 + $0x90] sm:$0xff] %v2762_v47  ;;  %v2692_v10 = vpop.permute.xlu2 %2691 }
 0x42d   : > { %v2766_v24 = vsel %vm2743_vm7, %v2692_v10, 0.0 }
 0x42e   : > { %2798 = vst [vmem:[%s4709_s21 + $0xb0] sm:$0xff] %v2766_v24 }
 0x43a   : > { %v2688_v40 = vpop.permute.xlu0 %2687 }
 0x43b   : > { %v2764_v46 = vsel %vm2743_vm7, %v2688_v40, 0.0 }
 0x43c   : > { %2796 = vst [vmem:[%s4709_s21 + $0xa0] sm:$0xff] %v2764_v46 }
 0x442   : > { %v2690_v35 = vpop.permute.xlu1 %2689 }
 0x443   : > { %v2765_v15 = vsel %vm2743_vm7, %v2690_v35, 0.0 }
 0x444   : > { %2797 = vst [vmem:[%s4709_s21 + $0xa8] sm:$0xff] %v2765_v15  ;;  %v2698_v34 = vpop.permute.xlu2 %2697 }
 0x445   : > { %v2769_v56 = vsel %vm2743_vm7, %v2698_v34, 0.0 }
 0x446   : > { %2801 = vst [vmem:[%s4709_s21 + $0xc8] sm:$0xff] %v2769_v56 }
 0x452   : > { %v2694_v8 = vpop.permute.xlu0 %2693 }
 0x453   : > { %v2767_v3 = vsel %vm2743_vm7, %v2694_v8, 0.0 }
 0x454   : > { %2799 = vst [vmem:[%s4709_s21 + $0xb8] sm:$0xff] %v2767_v3 }
 0x45a   : > { %v2696_v52 = vpop.permute.xlu1 %2695 }
 0x45b   : > { %v2768_v0 = vsel %vm2743_vm7, %v2696_v52, 0.0 }
 0x45c   : > { %2800 = vst [vmem:[%s4709_s21 + $0xc0] sm:$0xff] %v2768_v0  ;;  %v2704_v29 = vpop.permute.xlu2 %2703 }
 0x45d   : > { %v2772_v18 = vsel %vm2743_vm7, %v2704_v29, 0.0 }
 0x45e   : > { %2804 = vst [vmem:[%s4709_s21 + $0xe0] sm:$0xff] %v2772_v18 }
 0x46a   : > { %v2700_v33 = vpop.permute.xlu0 %2699 }
 0x46b   : > { %v2770_v51 = vsel %vm2743_vm7, %v2700_v33, 0.0 }
 0x46c   : > { %2802 = vst [vmem:[%s4709_s21 + $0xd0] sm:$0xff] %v2770_v51 }
 0x472   : > { %v2702_v23 = vpop.permute.xlu1 %2701 }
 0x473   : > { %v2771_v2 = vsel %vm2743_vm7, %v2702_v23, 0.0  ;;  %v2710_v11 = vpop.permute.xlu2 %2709 }
 0x474   : > { %2803 = vst [vmem:[%s4709_s21 + $0xd8] sm:$0xff] %v2771_v2  ;;  %v2775_v43 = vsel %vm2743_vm7, %v2710_v11, 0.0 }
 0x475   : > { %2807 = vst [vmem:[%s4709_s21 + $0xf8] sm:$0xff] %v2775_v43 }
 0x480   : > { %v2706_v55 = vpop.permute.xlu0 %2705 }
 0x481   : > { %v2773_v1 = vsel %vm2743_vm7, %v2706_v55, 0.0 }
 0x482   : > { %2805 = vst [vmem:[%s4709_s21 + $0xe8] sm:$0xff] %v2773_v1 }
 0x488   : > { %v2708_v31 = vpop.permute.xlu1 %2707 }
 0x489   : > { %v2774_v19 = vsel %vm2743_vm7, %v2708_v31, 0.0 }
 0x48a   : > { %2806 = vst [vmem:[%s4709_s21 + $0xf0] sm:$0xff] %v2774_v19 }
 0x48b   : > { %3139 = shalt.err (!%p3136_p3)
}
 0x48c   : > { %s3182_s16 = smov 128  }
 0x48d   : > { %3059 = dma.vmem_to_hbm [thread:$0]  (%p3271_p5), %s2822_s26, 4096, %s2824_s27, %s2809_s28, %s3182_s16, %s3182_s16, %s3180_s29  }
 0x48e PF: > { %p3065_p4 = scmp.ge.s32.totalorder %s3174_s12, 2  ;;  %s2838_s21 = sand.u32 1, %s3162_s30  }
 0x48f   : > { %s2839_s17 = scalar_lea.sflag [#allocation4], %s2838_s21 }
 0x490   : > { %p3062_p7 = pnand %p3065_p4, %p3275_p6 }
 0x492   : > { %p3063_p8 = pneg %p3062_p7 }
 0x494   : > { %3157 = dma.done.wait (%p3063_p8), %s2839_s17, 4096  }
 0x495   : > { %3159 = vsyncadd (%p3063_p8), %s2839_s17, 4294963200  ;;  %p19_p9 = scmp.ge.s32.totalorder %s3258_s15, 4   ;;  %s4946_s30 = smov %s3166_s10 }
 0x496   : > { %s4947_s10 = smov %s3170_s11  ;;  %s4948_s11 = smov %s3269_s18 }
 0x497   : > { %s4949_s12 = smov %s3258_s15  ;;  %21 = sbr.rel (!%p19_p9) target bundleno = 3 (0x3), region = 93 }
 0x49c   :  { %2845 = vsyncpa [#allocation4], 1 }
 0x49d   :  { %2847 = vsyncpa [#allocation4 + $0x1], 1 }

</bundles_post_ra>
